<compile_context>
chip_gen: v6e
topology: v6e:2x2x1
jax: 0.10.0
libtpu: 0.0.40
codegen_flags: <defaults>
</compile_context>

<pallas_src>
import functools
import math

import jax
import jax.numpy as jnp
from jax.experimental import pallas as pl
from jax.experimental.pallas import tpu as pltpu


# --------------------------------------------------------------------------
# Fused kernel: QKV projections + gated multi-head attention + W_o, one grid
# step per batch element.
# --------------------------------------------------------------------------
def _fused_gated_mha_kernel(x_ref, y_ref, z_ref, wq_ref, wk_ref, wv_ref,
                            wo_ref, thr_ref, *rest, scale, num_heads,
                            head_dim, use_dropout, mxu_dtype):
    if use_dropout:
        vmask_ref, omask_ref, o_ref = rest
    else:
        (o_ref,) = rest

    f32 = jnp.float32
    x = x_ref[0]                       # (Sq, q_in)
    y = y_ref[0]                       # (Sk, k_in)
    z = z_ref[0]                       # (Sk, v_in)

    # Full-width projections, amortized across heads (one MXU pass each).
    # 1/sqrt(d) is folded into Q so the (Sq,Sk) score tile needs no VPU scale;
    # the gate threshold below is expressed against these scaled scores.
    q = jnp.dot(x, wq_ref[...], preferred_element_type=f32) * scale   # (Sq,H)
    k = jnp.dot(y, wk_ref[...], preferred_element_type=f32)           # (Sk,H)
    v = jnp.dot(z, wv_ref[...], preferred_element_type=f32)           # (Sk,H)
    if use_dropout:
        v = v * vmask_ref[0]           # inverted-dropout mask, pre-scaled

    thr = thr_ref[0]                   # logit(rate): sigmoid(s)>rate <=> s>thr
    wo = wo_ref[...]                   # (H, q_out_pad)

    q_mm = q.astype(mxu_dtype)
    k_mm = k.astype(mxu_dtype)
    v_mm = v.astype(mxu_dtype)

    d = head_dim
    acc = jnp.zeros((q.shape[0], wo.shape[1]), f32)
    for h in range(num_heads):         # static unroll; heads are tiny tiles
        lo = h * d
        qh = q_mm[:, lo:lo + d]
        kh = k_mm[:, lo:lo + d]
        vh = v_mm[:, lo:lo + d]

        # Scores: contract last dims directly (no explicit transpose).
        s = jax.lax.dot_general(qh, kh, (((1,), (1,)), ((), ())),
                                preferred_element_type=f32)           # (Sq,Sk)

        # Softmax stats over ALL keys (softmax is computed before gating).
        m = jnp.max(s, axis=-1, keepdims=True)
        e = jnp.exp(s - m)
        denom = jnp.sum(e, axis=-1, keepdims=True)

        # Gate the unnormalized exponentials with the scalar score threshold.
        p = jnp.where(s > thr, e, jnp.float32(0.0))

        oh = jnp.dot(p.astype(mxu_dtype), vh,
                     preferred_element_type=f32)                      # (Sq,d)
        # Deferred softmax normalization on the (Sq,d) tile (EUP reciprocal).
        oh = oh * pl.reciprocal(denom, approx=True)

        # Fused per-head W_o accumulation (no HBM round trip of the merged
        # head output).
        acc = acc + jnp.dot(oh, wo[lo:lo + d, :], preferred_element_type=f32)

    if use_dropout:
        acc = acc * omask_ref[0]
    o_ref[0] = acc.astype(o_ref.dtype)


def _dropout_masks(key, p, B, Sq, Sk, num_hiddens, q_out):
    """Pre-scaled inverted-dropout keep masks for value and for the output."""
    keep = 1.0 - float(p)
    kv, ko = jax.random.split(key)
    v_mask = jax.random.bernoulli(kv, keep, (B, Sk, num_hiddens)).astype(
        jnp.float32) / keep
    o_mask = jax.random.bernoulli(ko, keep, (B, Sq, q_out)).astype(
        jnp.float32) / keep
    return v_mask, o_mask


# --------------------------------------------------------------------------
# Wrapper: full TopMulticrossAttention forward.
# --------------------------------------------------------------------------
def top_multicross_attention(X, Y, Z, rate, Wq, Wk, Wv, Wo, *, num_heads,
                             dropout_p=0.2, training=False, rng_key=None,
                             mxu_dtype=jnp.float32):
    B, Sq, q_in = X.shape
    Bk, Sk, k_in = Y.shape
    Bv, Sv, v_in = Z.shape
    assert B == Bk == Bv and Sk == Sv

    num_hiddens = Wq.shape[0]
    assert Wq.shape == (num_hiddens, q_in)
    assert Wk.shape[1] == k_in and Wv.shape[1] == v_in
    # The PyTorch module hard-codes W_k/W_v width to 512, so it is only
    # shape-consistent when num_hiddens == that width.
    assert Wk.shape[0] == Wv.shape[0] == num_hiddens
    q_out = Wo.shape[0]
    assert Wo.shape == (q_out, num_hiddens)
    assert num_hiddens % num_heads == 0
    d = num_hiddens // num_heads
    scale = 1.0 / math.sqrt(d)

    f32 = jnp.float32
    X = X.astype(f32); Y = Y.astype(f32); Z = Z.astype(f32)
    WqT = jnp.asarray(Wq, f32).T       # (q_in, num_hiddens)
    WkT = jnp.asarray(Wk, f32).T       # (k_in, num_hiddens)
    WvT = jnp.asarray(Wv, f32).T       # (v_in, num_hiddens)
    WoT = jnp.asarray(Wo, f32).T       # (num_hiddens, q_out)

    # Lane-dense output: pad W_o columns to a multiple of 128 (zeros) and
    # slice the real q_out columns back off after the kernel.
    q_out_pad = ((q_out + 127) // 128) * 128
    WoT_p = jnp.pad(WoT, ((0, 0), (0, q_out_pad - q_out)))

    # sigmoid(s) > rate  <=>  s > log(rate/(1-rate))  (rate in (0,1); clamp
    # the degenerate cases to +/-inf so the gate stays all-on / all-off).
    rate_f = jnp.asarray(rate, f32)
    thr = jnp.where(rate_f <= 0.0, -jnp.inf,
                    jnp.where(rate_f >= 1.0, jnp.inf,
                              jnp.log(rate_f) - jnp.log1p(-rate_f)))
    thr_arr = jnp.asarray(thr, f32).reshape(1)

    use_dropout = bool(training) and float(dropout_p) > 0.0
    v_mask = o_mask_p = None
    if use_dropout:
        assert rng_key is not None, "training mode needs rng_key"
        v_mask, o_mask = _dropout_masks(rng_key, dropout_p, B, Sq, Sk,
                                        num_hiddens, q_out)
        o_mask_p = jnp.pad(o_mask, ((0, 0), (0, 0), (0, q_out_pad - q_out)),
                           constant_values=1.0)

    in_specs = [
        pl.BlockSpec((1, Sq, q_in), lambda b: (b, 0, 0)),           # X[b]
        pl.BlockSpec((1, Sk, k_in), lambda b: (b, 0, 0)),           # Y[b]
        pl.BlockSpec((1, Sk, v_in), lambda b: (b, 0, 0)),           # Z[b]
        pl.BlockSpec((q_in, num_hiddens), lambda b: (0, 0)),        # Wq^T
        pl.BlockSpec((k_in, num_hiddens), lambda b: (0, 0)),        # Wk^T
        pl.BlockSpec((v_in, num_hiddens), lambda b: (0, 0)),        # Wv^T
        pl.BlockSpec((num_hiddens, q_out_pad), lambda b: (0, 0)),   # Wo^T pad
        pl.BlockSpec(memory_space=pltpu.MemorySpace.SMEM),          # thr
    ]
    inputs = [X, Y, Z, WqT, WkT, WvT, WoT_p, thr_arr]
    if use_dropout:
        in_specs.append(pl.BlockSpec((1, Sk, num_hiddens),
                                     lambda b: (b, 0, 0)))
        inputs.append(v_mask)
        in_specs.append(pl.BlockSpec((1, Sq, q_out_pad),
                                     lambda b: (b, 0, 0)))
        inputs.append(o_mask_p)

    out = pl.pallas_call(
        functools.partial(_fused_gated_mha_kernel, scale=scale,
                          num_heads=num_heads, head_dim=d,
                          use_dropout=use_dropout, mxu_dtype=mxu_dtype),
        out_shape=jax.ShapeDtypeStruct((B, Sq, q_out_pad), f32),
        grid=(B,),
        in_specs=in_specs,
        out_specs=pl.BlockSpec((1, Sq, q_out_pad), lambda b: (b, 0, 0)),
        compiler_params=pltpu.CompilerParams(
            dimension_semantics=("parallel",)),
    )(*inputs)

    return out[:, :, :q_out]


# --------------------------------------------------------------------------
# Pure-JAX reference (mirrors the PyTorch module, incl. d2l transpose helpers)
# --------------------------------------------------------------------------
_HI = jax.lax.Precision.HIGHEST


def _t_qkv(x, h):
    B, S, D = x.shape
    return x.reshape(B, S, h, D // h).transpose(0, 2, 1, 3).reshape(
        B * h, S, D // h)


def _t_out(x, h):
    BH, S, d = x.shape
    return x.reshape(BH // h, h, S, d).transpose(0, 2, 1, 3).reshape(
        BH // h, S, h * d)


def _ref_forward(X, Y, Z, rate, Wq, Wk, Wv, Wo, num_heads,
                 v_mask=None, o_mask=None):
    q = _t_qkv(jnp.einsum("bsi,oi->bso", X, Wq, precision=_HI), num_heads)
    k = _t_qkv(jnp.einsum("bsi,oi->bso", Y, Wk, precision=_HI), num_heads)
    v_full = jnp.einsum("bsi,oi->bso", Z, Wv, precision=_HI)
    if v_mask is not None:
        v_full = v_full * v_mask
    v = _t_qkv(v_full, num_heads)
    s = jnp.einsum("bqd,bkd->bqk", q, k, precision=_HI) / math.sqrt(q.shape[-1])
    attn = jax.nn.softmax(s, axis=-1)
    p = jnp.where(jax.nn.sigmoid(s) > rate, attn, 0.0)
    o = _t_out(jnp.einsum("bqk,bkd->bqd", p, v, precision=_HI), num_heads)
    out = jnp.einsum("bso,po->bsp", o, Wo, precision=_HI)
    if o_mask is not None:
        out = out * o_mask
    return out


def _check_close(got, want, name, atol=2e-3, rtol=2e-3, min_frac=0.98):
    # The score-threshold gate is hard: a score landing within float tolerance
    # of the boundary can legitimately flip between implementations, so allow
    # a tiny fraction of outliers.
    assert got.shape == want.shape
    close = jnp.abs(got - want) <= atol + rtol * jnp.abs(want)
    frac = float(jnp.mean(close.astype(jnp.float32)))
    assert frac >= min_frac, f"{name}: only {frac:.4f} of elements match"


if __name__ == "__main__":
    B = 2
    Sq, Sk = 8, 8
    query_size, key_size, value_size = 32, 48, 64
    num_hiddens = 512          # W_k / W_v widths are hard-coded to 512 in the module
    num_heads = 4
    dropout_p = 0.2
    rate = 0.5

    key = jax.random.PRNGKey(0)
    kx, ky, kz, kq, kk, kv, ko, kdrop = jax.random.split(key, 8)
    X = jax.random.normal(kx, (B, Sq, query_size), dtype=jnp.float32)
    Y = jax.random.normal(ky, (B, Sk, key_size), dtype=jnp.float32)
    Z = jax.random.normal(kz, (B, Sk, value_size), dtype=jnp.float32)
    # nn.Linear(bias=False) weights, PyTorch (out_features, in_features) layout.
    Wq = 0.05 * jax.random.normal(kq, (num_hiddens, query_size), dtype=jnp.float32)
    Wk = 0.05 * jax.random.normal(kk, (num_hiddens, key_size), dtype=jnp.float32)
    Wv = 0.05 * jax.random.normal(kv, (num_hiddens, value_size), dtype=jnp.float32)
    Wo = 0.05 * jax.random.normal(ko, (query_size, num_hiddens), dtype=jnp.float32)

    # --- eval mode (dropout = identity): check vs pure-JAX reference -------
    out_eval = top_multicross_attention(
        X, Y, Z, rate, Wq, Wk, Wv, Wo, num_heads=num_heads,
        dropout_p=dropout_p, training=False)
    out_eval = jax.block_until_ready(out_eval)
    ref_eval = _ref_forward(X, Y, Z, rate, Wq, Wk, Wv, Wo, num_heads)
    assert out_eval.shape == (B, Sq, query_size)
    assert bool(jnp.all(jnp.isfinite(out_eval)))
    _check_close(out_eval, ref_eval, "eval")

    # --- training mode: same dropout masks fed to kernel and reference -----
    out_train = top_multicross_attention(
        X, Y, Z, rate, Wq, Wk, Wv, Wo, num_heads=num_heads,
        dropout_p=dropout_p, training=True, rng_key=kdrop)
    out_train = jax.block_until_ready(out_train)
    v_mask, o_mask = _dropout_masks(kdrop, dropout_p, B, Sq, Sk,
                                    num_hiddens, query_size)
    ref_train = _ref_forward(X, Y, Z, rate, Wq, Wk, Wv, Wo, num_heads,
                             v_mask=v_mask, o_mask=o_mask)
    assert bool(jnp.all(jnp.isfinite(out_train)))
    _check_close(out_train, ref_train, "train")

    # --- head_dim = 64 (num_heads = 8): the 128-wide-head restriction is gone
    out_h8 = top_multicross_attention(
        X, Y, Z, rate, Wq, Wk, Wv, Wo, num_heads=8,
        dropout_p=dropout_p, training=False)
    out_h8 = jax.block_until_ready(out_h8)
    ref_h8 = _ref_forward(X, Y, Z, rate, Wq, Wk, Wv, Wo, 8)
    _check_close(out_h8, ref_h8, "heads8")

    # --- bf16 MXU operands (v6e/v7x fast path); rate far from the score
    #     distribution so the hard gate has no boundary sensitivity ---------
    out_bf16 = top_multicross_attention(
        X, Y, Z, 0.1, Wq, Wk, Wv, Wo, num_heads=num_heads,
        dropout_p=dropout_p, training=False, mxu_dtype=jnp.bfloat16)
    out_bf16 = jax.block_until_ready(out_bf16)
    ref_bf16 = _ref_forward(X, Y, Z, 0.1, Wq, Wk, Wv, Wo, num_heads)
    assert bool(jnp.all(jnp.isfinite(out_bf16)))
    _check_close(out_bf16, ref_bf16, "bf16", atol=2e-2, rtol=2e-2)

    print("KERNEL_OK")
</pallas_src>

<mosaic_0001>
module attributes {stable_mosaic.version = 11 : i64} {
  func.func @_fused_gated_mha_kernel(%arg0: i32, %arg1: memref<1x8x32xf32, #tpu.memory_space<vmem>>, %arg2: memref<1x8x48xf32, #tpu.memory_space<vmem>>, %arg3: memref<1x8x64xf32, #tpu.memory_space<vmem>>, %arg4: memref<32x512xf32, #tpu.memory_space<vmem>>, %arg5: memref<48x512xf32, #tpu.memory_space<vmem>>, %arg6: memref<64x512xf32, #tpu.memory_space<vmem>>, %arg7: memref<512x128xf32, #tpu.memory_space<vmem>>, %arg8: memref<1xf32, #tpu.memory_space<smem>>, %arg9: memref<1x8x128xf32, #tpu.memory_space<vmem>>) attributes {dimension_semantics = [#tpu.dimension_semantics<parallel>], iteration_bounds = array<i64: 2>, scalar_prefetch = 0 : i64, scratch_operands = 0 : i64, tpu.core_type = #tpu.core_type<tc>, window_params = [{transform_indices = @transform_0, window_bounds = array<i64: 1, 8, 32>}, {transform_indices = @transform_1, window_bounds = array<i64: 1, 8, 48>}, {transform_indices = @transform_2, window_bounds = array<i64: 1, 8, 64>}, {pipeline_mode = #tpu.pipeline_mode<synchronous>, transform_indices = @transform_3, window_bounds = array<i64: 32, 512>}, {pipeline_mode = #tpu.pipeline_mode<synchronous>, transform_indices = @transform_4, window_bounds = array<i64: 48, 512>}, {pipeline_mode = #tpu.pipeline_mode<synchronous>, transform_indices = @transform_5, window_bounds = array<i64: 64, 512>}, {pipeline_mode = #tpu.pipeline_mode<synchronous>, transform_indices = @transform_6, window_bounds = array<i64: 512, 128>}, {transform_indices = @transform_7, window_bounds = array<i64: 1>}, {transform_indices = @transform_8, window_bounds = array<i64: 1, 8, 128>}]} {
    %c0 = arith.constant 0 : index
    %c0_0 = arith.constant 0 : index
    %c0_1 = arith.constant 0 : index
    %0 = vector.load %arg1[%c0, %c0_0, %c0_1] : memref<1x8x32xf32, #tpu.memory_space<vmem>>, vector<1x8x32xf32>
    %1 = vector.shape_cast %0 : vector<1x8x32xf32> to vector<8x32xf32>
    %c0_2 = arith.constant 0 : index
    %c0_3 = arith.constant 0 : index
    %c0_4 = arith.constant 0 : index
    %2 = vector.load %arg2[%c0_2, %c0_3, %c0_4] : memref<1x8x48xf32, #tpu.memory_space<vmem>>, vector<1x8x48xf32>
    %3 = vector.shape_cast %2 : vector<1x8x48xf32> to vector<8x48xf32>
    %c0_5 = arith.constant 0 : index
    %c0_6 = arith.constant 0 : index
    %c0_7 = arith.constant 0 : index
    %4 = vector.load %arg3[%c0_5, %c0_6, %c0_7] : memref<1x8x64xf32, #tpu.memory_space<vmem>>, vector<1x8x64xf32>
    %5 = vector.shape_cast %4 : vector<1x8x64xf32> to vector<8x64xf32>
    %c0_8 = arith.constant 0 : index
    %c0_9 = arith.constant 0 : index
    %6 = vector.load %arg4[%c0_8, %c0_9] : memref<32x512xf32, #tpu.memory_space<vmem>>, vector<32x512xf32>
    %cst = arith.constant dense<0.000000e+00> : vector<8x512xf32>
    %7 = tpu.matmul %1, %6, %cst {dimension_numbers = #tpu.dot_dimension_numbers<[1], [0], [0], [1], [0, 0, 1, 1], [], []>} : vector<8x32xf32>, vector<32x512xf32>, vector<8x512xf32> -> vector<8x512xf32>
    %cst_10 = arith.constant 0.0883883461 : f32
    %8 = vector.broadcast %cst_10 : f32 to vector<8x512xf32>
    %9 = arith.mulf %7, %8 : vector<8x512xf32>
    %c0_11 = arith.constant 0 : index
    %c0_12 = arith.constant 0 : index
    %10 = vector.load %arg5[%c0_11, %c0_12] : memref<48x512xf32, #tpu.memory_space<vmem>>, vector<48x512xf32>
    %cst_13 = arith.constant dense<0.000000e+00> : vector<8x512xf32>
    %11 = tpu.matmul %3, %10, %cst_13 {dimension_numbers = #tpu.dot_dimension_numbers<[1], [0], [0], [1], [0, 0, 1, 1], [], []>} : vector<8x48xf32>, vector<48x512xf32>, vector<8x512xf32> -> vector<8x512xf32>
    %c0_14 = arith.constant 0 : index
    %c0_15 = arith.constant 0 : index
    %12 = vector.load %arg6[%c0_14, %c0_15] : memref<64x512xf32, #tpu.memory_space<vmem>>, vector<64x512xf32>
    %cst_16 = arith.constant dense<0.000000e+00> : vector<8x512xf32>
    %13 = tpu.matmul %5, %12, %cst_16 {dimension_numbers = #tpu.dot_dimension_numbers<[1], [0], [0], [1], [0, 0, 1, 1], [], []>} : vector<8x64xf32>, vector<64x512xf32>, vector<8x512xf32> -> vector<8x512xf32>
    %c0_17 = arith.constant 0 : index
    %14 = memref.load %arg8[%c0_17] : memref<1xf32, #tpu.memory_space<smem>>
    %c0_18 = arith.constant 0 : index
    %c0_19 = arith.constant 0 : index
    %15 = vector.load %arg7[%c0_18, %c0_19] : memref<512x128xf32, #tpu.memory_space<vmem>>, vector<512x128xf32>
    %cst_20 = arith.constant 0.000000e+00 : f32
    %16 = vector.broadcast %cst_20 : f32 to vector<8x128xf32>
    %17 = vector.extract_strided_slice %9 {offsets = [0, 0], sizes = [8, 128], strides = [1, 1]} : vector<8x512xf32> to vector<8x128xf32>
    %18 = vector.extract_strided_slice %11 {offsets = [0, 0], sizes = [8, 128], strides = [1, 1]} : vector<8x512xf32> to vector<8x128xf32>
    %19 = vector.extract_strided_slice %13 {offsets = [0, 0], sizes = [8, 128], strides = [1, 1]} : vector<8x512xf32> to vector<8x128xf32>
    %cst_21 = arith.constant dense<0.000000e+00> : vector<8x8xf32>
    %20 = tpu.matmul %17, %18, %cst_21 {dimension_numbers = #tpu.dot_dimension_numbers<[1], [1], [0], [0], [0, 0, 1, 0], [], []>} : vector<8x128xf32>, vector<8x128xf32>, vector<8x8xf32> -> vector<8x8xf32>
    %cst_22 = arith.constant dense<0xFF800000> : vector<8xf32>
    %21 = vector.multi_reduction <maximumf>, %20, %cst_22 [1] : vector<8x8xf32> to vector<8xf32>
    %22 = vector.shape_cast %21 : vector<8xf32> to vector<8x1xf32>
    %23 = vector.broadcast %22 : vector<8x1xf32> to vector<8x8xf32>
    %24 = arith.subf %20, %23 : vector<8x8xf32>
    %25 = math.exp %24 : vector<8x8xf32>
    %cst_23 = arith.constant dense<0.000000e+00> : vector<8xf32>
    %26 = vector.multi_reduction <add>, %25, %cst_23 [1] : vector<8x8xf32> to vector<8xf32>
    %27 = vector.shape_cast %26 : vector<8xf32> to vector<8x1xf32>
    %28 = vector.broadcast %14 : f32 to vector<8x8xf32>
    %29 = arith.cmpf ogt, %20, %28 : vector<8x8xf32>
    %cst_24 = arith.constant 0.000000e+00 : f32
    %30 = vector.broadcast %cst_24 : f32 to vector<8x8xf32>
    %31 = arith.select %29, %25, %30 : vector<8x8xi1>, vector<8x8xf32>
    %cst_25 = arith.constant dense<0.000000e+00> : vector<8x128xf32>
    %32 = tpu.matmul %31, %19, %cst_25 {dimension_numbers = #tpu.dot_dimension_numbers<[1], [0], [0], [1], [0, 0, 1, 1], [], []>} : vector<8x8xf32>, vector<8x128xf32>, vector<8x128xf32> -> vector<8x128xf32>
    %33 = tpu.reciprocal %27 {approx = true} : vector<8x1xf32> -> vector<8x1xf32>
    %34 = vector.broadcast %33 : vector<8x1xf32> to vector<8x128xf32>
    %35 = arith.mulf %32, %34 : vector<8x128xf32>
    %36 = vector.extract_strided_slice %15 {offsets = [0, 0], sizes = [128, 128], strides = [1, 1]} : vector<512x128xf32> to vector<128x128xf32>
    %cst_26 = arith.constant dense<0.000000e+00> : vector<8x128xf32>
    %37 = tpu.matmul %35, %36, %cst_26 {dimension_numbers = #tpu.dot_dimension_numbers<[1], [0], [0], [1], [0, 0, 1, 1], [], []>} : vector<8x128xf32>, vector<128x128xf32>, vector<8x128xf32> -> vector<8x128xf32>
    %38 = arith.addf %16, %37 : vector<8x128xf32>
    %39 = vector.extract_strided_slice %9 {offsets = [0, 128], sizes = [8, 128], strides = [1, 1]} : vector<8x512xf32> to vector<8x128xf32>
    %40 = vector.extract_strided_slice %11 {offsets = [0, 128], sizes = [8, 128], strides = [1, 1]} : vector<8x512xf32> to vector<8x128xf32>
    %41 = vector.extract_strided_slice %13 {offsets = [0, 128], sizes = [8, 128], strides = [1, 1]} : vector<8x512xf32> to vector<8x128xf32>
    %cst_27 = arith.constant dense<0.000000e+00> : vector<8x8xf32>
    %42 = tpu.matmul %39, %40, %cst_27 {dimension_numbers = #tpu.dot_dimension_numbers<[1], [1], [0], [0], [0, 0, 1, 0], [], []>} : vector<8x128xf32>, vector<8x128xf32>, vector<8x8xf32> -> vector<8x8xf32>
    %cst_28 = arith.constant dense<0xFF800000> : vector<8xf32>
    %43 = vector.multi_reduction <maximumf>, %42, %cst_28 [1] : vector<8x8xf32> to vector<8xf32>
    %44 = vector.shape_cast %43 : vector<8xf32> to vector<8x1xf32>
    %45 = vector.broadcast %44 : vector<8x1xf32> to vector<8x8xf32>
    %46 = arith.subf %42, %45 : vector<8x8xf32>
    %47 = math.exp %46 : vector<8x8xf32>
    %cst_29 = arith.constant dense<0.000000e+00> : vector<8xf32>
    %48 = vector.multi_reduction <add>, %47, %cst_29 [1] : vector<8x8xf32> to vector<8xf32>
    %49 = vector.shape_cast %48 : vector<8xf32> to vector<8x1xf32>
    %50 = vector.broadcast %14 : f32 to vector<8x8xf32>
    %51 = arith.cmpf ogt, %42, %50 : vector<8x8xf32>
    %cst_30 = arith.constant 0.000000e+00 : f32
    %52 = vector.broadcast %cst_30 : f32 to vector<8x8xf32>
    %53 = arith.select %51, %47, %52 : vector<8x8xi1>, vector<8x8xf32>
    %cst_31 = arith.constant dense<0.000000e+00> : vector<8x128xf32>
    %54 = tpu.matmul %53, %41, %cst_31 {dimension_numbers = #tpu.dot_dimension_numbers<[1], [0], [0], [1], [0, 0, 1, 1], [], []>} : vector<8x8xf32>, vector<8x128xf32>, vector<8x128xf32> -> vector<8x128xf32>
    %55 = tpu.reciprocal %49 {approx = true} : vector<8x1xf32> -> vector<8x1xf32>
    %56 = vector.broadcast %55 : vector<8x1xf32> to vector<8x128xf32>
    %57 = arith.mulf %54, %56 : vector<8x128xf32>
    %58 = vector.extract_strided_slice %15 {offsets = [128, 0], sizes = [128, 128], strides = [1, 1]} : vector<512x128xf32> to vector<128x128xf32>
    %cst_32 = arith.constant dense<0.000000e+00> : vector<8x128xf32>
    %59 = tpu.matmul %57, %58, %cst_32 {dimension_numbers = #tpu.dot_dimension_numbers<[1], [0], [0], [1], [0, 0, 1, 1], [], []>} : vector<8x128xf32>, vector<128x128xf32>, vector<8x128xf32> -> vector<8x128xf32>
    %60 = arith.addf %38, %59 : vector<8x128xf32>
    %61 = vector.extract_strided_slice %9 {offsets = [0, 256], sizes = [8, 128], strides = [1, 1]} : vector<8x512xf32> to vector<8x128xf32>
    %62 = vector.extract_strided_slice %11 {offsets = [0, 256], sizes = [8, 128], strides = [1, 1]} : vector<8x512xf32> to vector<8x128xf32>
    %63 = vector.extract_strided_slice %13 {offsets = [0, 256], sizes = [8, 128], strides = [1, 1]} : vector<8x512xf32> to vector<8x128xf32>
    %cst_33 = arith.constant dense<0.000000e+00> : vector<8x8xf32>
    %64 = tpu.matmul %61, %62, %cst_33 {dimension_numbers = #tpu.dot_dimension_numbers<[1], [1], [0], [0], [0, 0, 1, 0], [], []>} : vector<8x128xf32>, vector<8x128xf32>, vector<8x8xf32> -> vector<8x8xf32>
    %cst_34 = arith.constant dense<0xFF800000> : vector<8xf32>
    %65 = vector.multi_reduction <maximumf>, %64, %cst_34 [1] : vector<8x8xf32> to vector<8xf32>
    %66 = vector.shape_cast %65 : vector<8xf32> to vector<8x1xf32>
    %67 = vector.broadcast %66 : vector<8x1xf32> to vector<8x8xf32>
    %68 = arith.subf %64, %67 : vector<8x8xf32>
    %69 = math.exp %68 : vector<8x8xf32>
    %cst_35 = arith.constant dense<0.000000e+00> : vector<8xf32>
    %70 = vector.multi_reduction <add>, %69, %cst_35 [1] : vector<8x8xf32> to vector<8xf32>
    %71 = vector.shape_cast %70 : vector<8xf32> to vector<8x1xf32>
    %72 = vector.broadcast %14 : f32 to vector<8x8xf32>
    %73 = arith.cmpf ogt, %64, %72 : vector<8x8xf32>
    %cst_36 = arith.constant 0.000000e+00 : f32
    %74 = vector.broadcast %cst_36 : f32 to vector<8x8xf32>
    %75 = arith.select %73, %69, %74 : vector<8x8xi1>, vector<8x8xf32>
    %cst_37 = arith.constant dense<0.000000e+00> : vector<8x128xf32>
    %76 = tpu.matmul %75, %63, %cst_37 {dimension_numbers = #tpu.dot_dimension_numbers<[1], [0], [0], [1], [0, 0, 1, 1], [], []>} : vector<8x8xf32>, vector<8x128xf32>, vector<8x128xf32> -> vector<8x128xf32>
    %77 = tpu.reciprocal %71 {approx = true} : vector<8x1xf32> -> vector<8x1xf32>
    %78 = vector.broadcast %77 : vector<8x1xf32> to vector<8x128xf32>
    %79 = arith.mulf %76, %78 : vector<8x128xf32>
    %80 = vector.extract_strided_slice %15 {offsets = [256, 0], sizes = [128, 128], strides = [1, 1]} : vector<512x128xf32> to vector<128x128xf32>
    %cst_38 = arith.constant dense<0.000000e+00> : vector<8x128xf32>
    %81 = tpu.matmul %79, %80, %cst_38 {dimension_numbers = #tpu.dot_dimension_numbers<[1], [0], [0], [1], [0, 0, 1, 1], [], []>} : vector<8x128xf32>, vector<128x128xf32>, vector<8x128xf32> -> vector<8x128xf32>
    %82 = arith.addf %60, %81 : vector<8x128xf32>
    %83 = vector.extract_strided_slice %9 {offsets = [0, 384], sizes = [8, 128], strides = [1, 1]} : vector<8x512xf32> to vector<8x128xf32>
    %84 = vector.extract_strided_slice %11 {offsets = [0, 384], sizes = [8, 128], strides = [1, 1]} : vector<8x512xf32> to vector<8x128xf32>
    %85 = vector.extract_strided_slice %13 {offsets = [0, 384], sizes = [8, 128], strides = [1, 1]} : vector<8x512xf32> to vector<8x128xf32>
    %cst_39 = arith.constant dense<0.000000e+00> : vector<8x8xf32>
    %86 = tpu.matmul %83, %84, %cst_39 {dimension_numbers = #tpu.dot_dimension_numbers<[1], [1], [0], [0], [0, 0, 1, 0], [], []>} : vector<8x128xf32>, vector<8x128xf32>, vector<8x8xf32> -> vector<8x8xf32>
    %cst_40 = arith.constant dense<0xFF800000> : vector<8xf32>
    %87 = vector.multi_reduction <maximumf>, %86, %cst_40 [1] : vector<8x8xf32> to vector<8xf32>
    %88 = vector.shape_cast %87 : vector<8xf32> to vector<8x1xf32>
    %89 = vector.broadcast %88 : vector<8x1xf32> to vector<8x8xf32>
    %90 = arith.subf %86, %89 : vector<8x8xf32>
    %91 = math.exp %90 : vector<8x8xf32>
    %cst_41 = arith.constant dense<0.000000e+00> : vector<8xf32>
    %92 = vector.multi_reduction <add>, %91, %cst_41 [1] : vector<8x8xf32> to vector<8xf32>
    %93 = vector.shape_cast %92 : vector<8xf32> to vector<8x1xf32>
    %94 = vector.broadcast %14 : f32 to vector<8x8xf32>
    %95 = arith.cmpf ogt, %86, %94 : vector<8x8xf32>
    %cst_42 = arith.constant 0.000000e+00 : f32
    %96 = vector.broadcast %cst_42 : f32 to vector<8x8xf32>
    %97 = arith.select %95, %91, %96 : vector<8x8xi1>, vector<8x8xf32>
    %cst_43 = arith.constant dense<0.000000e+00> : vector<8x128xf32>
    %98 = tpu.matmul %97, %85, %cst_43 {dimension_numbers = #tpu.dot_dimension_numbers<[1], [0], [0], [1], [0, 0, 1, 1], [], []>} : vector<8x8xf32>, vector<8x128xf32>, vector<8x128xf32> -> vector<8x128xf32>
    %99 = tpu.reciprocal %93 {approx = true} : vector<8x1xf32> -> vector<8x1xf32>
    %100 = vector.broadcast %99 : vector<8x1xf32> to vector<8x128xf32>
    %101 = arith.mulf %98, %100 : vector<8x128xf32>
    %102 = vector.extract_strided_slice %15 {offsets = [384, 0], sizes = [128, 128], strides = [1, 1]} : vector<512x128xf32> to vector<128x128xf32>
    %cst_44 = arith.constant dense<0.000000e+00> : vector<8x128xf32>
    %103 = tpu.matmul %101, %102, %cst_44 {dimension_numbers = #tpu.dot_dimension_numbers<[1], [0], [0], [1], [0, 0, 1, 1], [], []>} : vector<8x128xf32>, vector<128x128xf32>, vector<8x128xf32> -> vector<8x128xf32>
    %104 = arith.addf %82, %103 : vector<8x128xf32>
    %c0_45 = arith.constant 0 : index
    %c0_46 = arith.constant 0 : index
    %c0_47 = arith.constant 0 : index
    %105 = vector.load %arg9[%c0_45, %c0_46, %c0_47] : memref<1x8x128xf32, #tpu.memory_space<vmem>>, vector<1x8x128xf32>
    %106 = vector.shape_cast %105 : vector<1x8x128xf32> to vector<8x128xf32>
    %107 = vector.shape_cast %104 : vector<8x128xf32> to vector<1x8x128xf32>
    tpu.vector_store %arg9[%c0_45, %c0_46, %c0_47], %107 {strides = array<i32>} : memref<1x8x128xf32, #tpu.memory_space<vmem>>, vector<1x8x128xf32>,
    return
  }
  func.func @transform_0(%arg0: i32) -> (i32, i32, i32) {
    %c0_i32 = arith.constant 0 : i32
    %c0_i32_0 = arith.constant 0 : i32
    %c0_i32_1 = arith.constant 0 : i32
    return %arg0, %c0_i32, %c0_i32_0 : i32, i32, i32
  }
  func.func @transform_1(%arg0: i32) -> (i32, i32, i32) {
    %c0_i32 = arith.constant 0 : i32
    %c0_i32_0 = arith.constant 0 : i32
    %c0_i32_1 = arith.constant 0 : i32
    return %arg0, %c0_i32, %c0_i32_0 : i32, i32, i32
  }
  func.func @transform_2(%arg0: i32) -> (i32, i32, i32) {
    %c0_i32 = arith.constant 0 : i32
    %c0_i32_0 = arith.constant 0 : i32
    %c0_i32_1 = arith.constant 0 : i32
    return %arg0, %c0_i32, %c0_i32_0 : i32, i32, i32
  }
  func.func @transform_3(%arg0: i32) -> (i32, i32) {
    %c0_i32 = arith.constant 0 : i32
    %c0_i32_0 = arith.constant 0 : i32
    %c0_i32_1 = arith.constant 0 : i32
    return %c0_i32, %c0_i32_0 : i32, i32
  }
  func.func @transform_4(%arg0: i32) -> (i32, i32) {
    %c0_i32 = arith.constant 0 : i32
    %c0_i32_0 = arith.constant 0 : i32
    %c0_i32_1 = arith.constant 0 : i32
    return %c0_i32, %c0_i32_0 : i32, i32
  }
  func.func @transform_5(%arg0: i32) -> (i32, i32) {
    %c0_i32 = arith.constant 0 : i32
    %c0_i32_0 = arith.constant 0 : i32
    %c0_i32_1 = arith.constant 0 : i32
    return %c0_i32, %c0_i32_0 : i32, i32
  }
  func.func @transform_6(%arg0: i32) -> (i32, i32) {
    %c0_i32 = arith.constant 0 : i32
    %c0_i32_0 = arith.constant 0 : i32
    %c0_i32_1 = arith.constant 0 : i32
    return %c0_i32, %c0_i32_0 : i32, i32
  }
  func.func @transform_7(%arg0: i32) -> i32 {
    %c0_i32 = arith.constant 0 : i32
    %c0_i32_0 = arith.constant 0 : i32
    return %c0_i32 : i32
  }
  func.func @transform_8(%arg0: i32) -> (i32, i32, i32) {
    %c0_i32 = arith.constant 0 : i32
    %c0_i32_0 = arith.constant 0 : i32
    %c0_i32_1 = arith.constant 0 : i32
    return %arg0, %c0_i32, %c0_i32_0 : i32, i32, i32
  }
}

</mosaic_0001>

<bundles_post_ra>
// kernel: tpu_custom_call.1
= control target key start
LH: loop header
LB: loop body
LE: loop exit
PB: predicated region body
PF: predicated region fallthrough
CT: control target
= control target key end

     0   :  { %s3280_s0 = inlined_call_operand.hbm [shape: f32[2,8,32], index: 0, kind: input, shape index: {}]   ;;  %s3281_s1 = inlined_call_operand.hbm [shape: f32[2,8,48], index: 1, kind: input, shape index: {}]   ;;  %s3282_s2 = inlined_call_operand.hbm [shape: f32[2,8,64], index: 2, kind: input, shape index: {}]   ;;  %s3283_s3 = inlined_call_operand.hbm [shape: f32[32,512], index: 3, kind: input, shape index: {}]   ;;  %s3284_s4 = inlined_call_operand.hbm [shape: f32[48,512], index: 4, kind: input, shape index: {}]   ;;  %s3285_s5 = inlined_call_operand.hbm [shape: f32[64,512], index: 5, kind: input, shape index: {}]   ;;  %s3286_s6 = inlined_call_operand.hbm [shape: f32[512,128], index: 6, kind: input, shape index: {}]   ;;  %s3287_s7 = inlined_call_operand.<no memory space> [shape: f32[1], index: 7, kind: input, shape index: {}]   ;;  %s3288_s8 = inlined_call_operand.hbm [shape: f32[2,8,128], index: 8, kind: output, shape index: {}]  }
   0x1   :  { %3304 = sst [smem:[#allocation24_spill]] %s3281_s1 }
   0x2   :  { %3305 = sst [smem:[#allocation25_spill]] %s3283_s3 }
   0x3   :  { %3306 = sst [smem:[#allocation26_spill]] %s3284_s4 }
   0x4   :  { %3307 = sst [smem:[#allocation27_spill]] %s3285_s5 }
   0x5   :  { %13 = sst [smem:[#allocation2]] %s3287_s7 }
   0x6   :  { %14 = vsyncpa [#allocation4], 0 }
   0x7   :  { %16 = vsyncpa [#allocation4 + $0x1], 0 }
   0x8   :  { %17 = vsyncpa [#allocation7], 0 }
   0x9   :  { %19 = vsyncpa [#allocation7 + $0x1], 0 }
   0xa   :  { %20 = vsyncpa [#allocation10], 0 }
   0xb   :  { %21 = vsyncpa [#allocation13], 0 }
   0xc   :  { %22 = vsyncpa [#allocation5], 0 }
   0xd   :  { %24 = vsyncpa [#allocation5 + $0x1], 0  ;;  %s2854_s29 = smov 0   ;;  %s2856_s30 = smov 0  }
   0xe   :  { %s2858_s9 = smov 0   ;;  %s2860_s10 = smov 0  }
   0xf LB: > { %3308 = sst [smem:[#allocation21_spill]] %s2790_s10  ;;  %s2792_s7 = smov [#allocation9]   ;;  %s2790_s10 = sphi %s2860_s10, %s3339_s10   ;;  %s2786_s9 = sphi %s2858_s9, %s3343_s9   ;;  %s2782_s30 = sphi %s2856_s30, %s3342_s30   ;;  %s2778_s29 = sphi %s2854_s29, %s3341_s29  }
  0x10   : > { %s256_s11 = sshll.u32 %s2792_s7, 4  ;;  %s2875_s12 = sadd.s32 4294967295, %s2790_s10   ;;  %s257_s11 = int_to_ptr.vmem [resolvable:$true] %s256_s11 }
  0x11   : > { %p2108_p0 = scmp.ge.s32.totalorder %s2790_s10, 1  ;;  %p3296_p1 = scmp.eq.s32.totalorder %s2875_s12, 0 }
  0x12   : > { %p244_p2 = scmp.lt.s32.totalorder %s2790_s10, 3  ;;  %s2793_s14 = smov [#allocation12]  }
  0x13   : > { %s282_s15 = sshll.u32 %s2793_s14, 4  ;;  %s2537_s17 = scalar_lea.vmem %s257_s11, 2048  ;;  %s283_s15 = int_to_ptr.vmem [resolvable:$true] %s282_s15 }
  0x14   : > { %p2880_p3 = pnand %p2108_p0, %p244_p2  ;;  %p2538_p8 = scmp.ne.s32.totalorder %s257_s11, %s2537_s17 }
  0x15   : > { %p2545_p11 = scmp.lt.s32.totalorder %s257_s11, %s257_s11  ;;  %p2546_p12 = scmp.lt.s32.totalorder %s2537_s17, %s2537_s17 }
  0x16   : > { %s3309_s13 = scalar_select %p2880_p3, 1, 0 }
  0x17   : > { %p2431_p5 = pneg %p2880_p3  ;;  %p2547_p13 = por %p2546_p12, %p2545_p11 }
  0x19   : > { %p2889_p6 = pnand %p2431_p5, %p3296_p1 }
  0x1b   : > { %s3310_s16 = scalar_select %p2889_p6, 1, 0 }
  0x1c   : > { %p3289_p7 = pneg %p2889_p6 }
  0x1e   : > { %p2540_p9 = pnand %p2538_p8, %p3289_p7 }
  0x20   : > { %p2541_p10 = pneg %p2540_p9 }
  0x22   : > { %p2548_p0 = pnand %p2547_p13, %p2541_p10 }
  0x24   : > { %2551 = shalt.err (!%p2548_p0)
}
  0x25   : > { %s3291_s18 = smov 512   ;;  %s3292_s19 = smov 32  }
  0x26   : > { %s3311_s3 = sld [smem:[#allocation25_spill]]  ;;  %s2563_s22 = scalar_lea.vmem %s283_s15, 4096 }
  0x27   : > { %p2564_p2 = scmp.ne.s32.totalorder %s283_s15, %s2563_s22  ;;  %p2571_p9 = scmp.lt.s32.totalorder %s283_s15, %s283_s15 }
  0x28   : > { %p2572_p10 = scmp.lt.s32.totalorder %s2563_s22, %s2563_s22 }
  0x29   : > { %p2566_p5 = pnand %p2564_p2, %p3289_p7 }
  0x2a   : > { %p2573_p11 = por %p2572_p10, %p2571_p9 }
  0x2b   : > { %p2567_p8 = pneg %p2566_p5 }
  0x2c   : > { %2434 = dma.hbm_to_vmem [thread:$0]  (!%p2889_p6), %s3311_s3, 2048, %s257_s11, [#allocation10], %s3291_s18, %s3291_s18, %s3292_s19  }
  0x2d   : > { %p2574_p12 = pnand %p2573_p11, %p2567_p8 }
  0x2f   : > { %2577 = shalt.err (!%p2574_p12)
}
  0x30   : > { %s3312_s5 = sld [smem:[#allocation27_spill]]  ;;  %s2107_s25 = sadd.s32 4294967294, %s2790_s10  }
  0x31   : > { %s2919_s26 = sadd.s32 1, %s2790_s10   ;;  %s37_s28 = sadd.s32 1, %s2786_s9 }
  0x32   : > { %3313 = sst [smem:[#allocation22_spill]] %s2919_s26  ;;  %s34_s27 = ssub.s32 %s2790_s10, %s2919_s26 }
  0x33   : > { %p35_p13 = scmp.eq.s32.totalorder %s34_s27, 0  ;;  %p44_p0 = scmp.ne.s32.totalorder %s2786_s9, %s2782_s30 }
  0x34   : > { %p45_p2 = scmp.eq.s32.totalorder %s2790_s10, 0  ;;  %p50_p5 = scmp.ne.s32.totalorder %s2782_s30, %s2778_s29 }
  0x35   : > { %s2930_s7 = scalar_select %p35_p13, %s2786_s9, %s37_s28  }
  0x36   : > { %2440 = dma.hbm_to_vmem [thread:$0]  (!%p2889_p6), %s3312_s5, 4096, %s283_s15, [#allocation13], %s3291_s18, %s3291_s18, %s3292_s19  }
  0x37   : > { %3314 = sst [smem:[#allocation23_spill]] %s2930_s7  ;;  %p46_p8 = por %p45_p2, %p44_p0 }
  0x38   : > { %p2934_p9 = por %p3296_p1, %p50_p5  ;;  %p231_p10 = scmp.eq.s32.totalorder %s2875_s12, 1 }
  0x39   : > { %p237_p11 = scmp.eq.s32.totalorder %s2107_s25, 1  ;;  %p2462_p12 = scmp.lt.s32.totalorder %s2790_s10, 2 }
  0x3a   : > { %s3315_s11 = scalar_select %p2934_p9, 1, 0 }
  0x3b   : > { %s3290_s14 = sand.u32 1, %s2786_s9   ;;  %p2941_p4 = por %p231_p10, %p44_p0 }
  0x3c   : > { %p2945_p7 = por %p237_p11, %p50_p5  ;;  %s2951_s20 = sshll.u32 %s3290_s14, 3 }
  0x3d   : > { %s3316_s15 = scalar_select %p2941_p4, 1, 0 }
  0x3e   : > { %s3317_s17 = scalar_select %p2945_p7, 1, 0 }
  0x3f   : > { %s2954_s21 = sshll.u32 %s2790_s10, 7  ;;  %p2956_p13 = pnand %p2462_p12, %p46_p8 }
  0x40   : > { %s330_s23 = sand.u32 1, %s2790_s10   ;;  %s3319_s1 = sld [smem:[#allocation24_spill]] }
  0x41   : > { %s334_s28 = scalar_lea.vmem [#allocation6], %s2951_s20  ;;  %s2796_s18 = smov [#allocation11]  }
  0x42   : > { %s341_s14 = sshll.u32 %s334_s28, 4  ;;  %s269_s19 = sshll.u32 %s2796_s18, 4  ;;  %s2968_s14 = int_to_ptr.vmem [resolvable:$true] %s341_s14  ;;  %s270_s19 = int_to_ptr.vmem [resolvable:$true] %s269_s19 }
  0x43   : > { %s2970_s3 = scalar_lea.sflag [#allocation7], %s330_s23  ;;  %p2976_p2 = pneg %p2956_p13 }
  0x45   : > { %s3320_s7 = scalar_select %p2976_p2, 1, 0 }
  0x46   : > { %s2965_s27 = scalar_lea.hbm %s3319_s1, %s2954_s21  ;;  %s2583_s28 = scalar_lea.hbm %s3319_s1, 256 }
  0x47   : > { %s2578_s5 = scalar_lea.hbm %s2965_s27, 128  ;;  %p2584_p10 = scmp.lt.s32.totalorder %s2965_s27, %s3319_s1 }
  0x48   : > { %p2579_p0 = scmp.ne.s32.totalorder %s2965_s27, %s2578_s5  ;;  %p2585_p11 = scmp.lt.s32.totalorder %s2583_s28, %s2578_s5 }
  0x4a   : > { %p2581_p5 = pnand %p2976_p2, %p2579_p0  ;;  %p2586_p12 = por %p2585_p11, %p2584_p10 }
  0x4c   : > { %p2582_p8 = pneg %p2581_p5 }
  0x4e   : > { %p2587_p1 = pnand %p2586_p12, %p2582_p8 }
  0x50   : > { %2590 = shalt.err (!%p2587_p1)
}
  0x51   : > { %s2591_s18 = scalar_lea.vmem %s2968_s14, 128  ;;  %s2797_s23 = smov [#allocation6]  }
  0x52   : > { %p2592_p7 = scmp.ne.s32.totalorder %s2968_s14, %s2591_s18  ;;  %s2596_s24 = sshll.u32 %s2797_s23, 4  ;;  %s2597_s24 = int_to_ptr.vmem [resolvable:$false] %s2596_s24 }
  0x53   : > { %s2598_s25 = scalar_lea.vmem %s2597_s24, 256  ;;  %p2599_p4 = scmp.lt.s32.totalorder %s2968_s14, %s2597_s24 }
  0x54   : > { %p2594_p0 = pnand %p2592_p7, %p2976_p2  ;;  %p2600_p9 = scmp.lt.s32.totalorder %s2598_s25, %s2591_s18 }
  0x56   : > { %p2595_p5 = pneg %p2594_p0  ;;  %p2601_p3 = por %p2600_p9, %p2599_p4 }
  0x58   : > { %p2602_p6 = pnand %p2601_p3, %p2595_p5 }
  0x5a   : > { %2605 = shalt.err (!%p2602_p6)
}
  0x5b   : > { %2450 = dma.hbm_to_vmem [thread:$0]  (!%p2956_p13), %s2965_s27, 128, %s2968_s14, %s2970_s3  }
  0x5c   : > { %s2617_s5 = scalar_lea.vmem %s270_s19, 3072  ;;  %p3321_p7 = scmp.ne.s32.totalorder %s3310_s16, 0 }
  0x5d   : > { %p2618_p1 = scmp.ne.s32.totalorder %s270_s19, %s2617_s5  ;;  %p2625_p12 = scmp.lt.s32.totalorder %s270_s19, %s270_s19 }
  0x5e   : > { %p3322_p8 = pneg %p3321_p7  ;;  %p2626_p0 = scmp.lt.s32.totalorder %s2617_s5, %s2617_s5 }
  0x60   : > { %p2620_p10 = pnand %p2618_p1, %p3322_p8  ;;  %p2627_p2 = por %p2626_p0, %p2625_p12 }
  0x62   : > { %p2621_p11 = pneg %p2620_p10 }
  0x64   : > { %p2628_p4 = pnand %p2627_p2, %p2621_p11 }
  0x66   : > { %2631 = shalt.err (!%p2628_p4)
}
  0x67   : > { %s3323_s10 = smov 32   ;;  %s3324_s26 = smov 512  }
  0x68   : > { %s3325_s4 = sld [smem:[#allocation26_spill]]  ;;  %s2798_s14 = smov [#allocation14]  }
  0x69   : > { %s295_s27 = sshll.u32 %s2798_s14, 4  ;;  %p3326_p6 = pmov %p3322_p8  ;;  %s296_s27 = int_to_ptr.vmem [resolvable:$true] %s295_s27 }
  0x6a   : > { %s2643_s23 = scalar_lea.vmem %s296_s27, 8192  ;;  %p2651_p5 = scmp.lt.s32.totalorder %s296_s27, %s296_s27 }
  0x6b   : > { %p2644_p3 = scmp.ne.s32.totalorder %s296_s27, %s2643_s23  ;;  %p2652_p1 = scmp.lt.s32.totalorder %s2643_s23, %s2643_s23 }
  0x6d   : > { %p2646_p9 = pnand %p2644_p3, %p3326_p6  ;;  %p2653_p8 = por %p2652_p1, %p2651_p5 }
  0x6e   : > { %2437 = dma.hbm_to_vmem [thread:$0]  (!%p3321_p7), %s3325_s4, 3072, %s270_s19, [#allocation10], %s3324_s26, %s3324_s26, %s3323_s10  }
  0x6f   : > { %p2647_p2 = pneg %p2646_p9 }
  0x71   : > { %p2654_p10 = pnand %p2653_p8, %p2647_p2 }
  0x73   : > { %2657 = shalt.err (!%p2654_p10)
}
  0x74   : > { %s2799_s24 = smov 128   ;;  %s2800_s19 = smov 8  }
  0x75   : > { %2443 = dma.hbm_to_vmem [thread:$0]  (!%p3321_p7), %s3286_s6, 8192, %s296_s27, [#allocation13], %s2799_s24, %s2799_s24, %s2800_s19  }
  0x76   : > { %s3022_s28 = scalar_lea.hbm %s3280_s0, %s2954_s21  ;;  %s316_s18 = scalar_lea.vmem [#allocation3], %s2951_s20 }
  0x77   : > { %s323_s14 = sshll.u32 %s316_s18, 4  ;;  %s3327_s23 = sand.u32 1, %s2786_s9   ;;  %s324_s14 = int_to_ptr.vmem [resolvable:$true] %s323_s14 }
  0x78   : > { %s313_s1 = scalar_lea.sflag [#allocation4], %s3327_s23  ;;  %s2658_s4 = scalar_lea.hbm %s3022_s28, 128 }
  0x79   : > { %p2659_p11 = scmp.ne.s32.totalorder %s3022_s28, %s2658_s4  ;;  %p3328_p12 = scmp.ne.s32.totalorder %s3320_s7, 0 }
  0x7a   : > { %s2663_s24 = scalar_lea.hbm %s3280_s0, 256  ;;  %p2664_p7 = scmp.lt.s32.totalorder %s3022_s28, %s3280_s0 }
  0x7b   : > { %p2661_p0 = pnand %p2659_p11, %p3328_p12  ;;  %p2665_p3 = scmp.lt.s32.totalorder %s2663_s24, %s2658_s4 }
  0x7d   : > { %p2662_p4 = pneg %p2661_p0  ;;  %p2666_p6 = por %p2665_p3, %p2664_p7 }
  0x7f   : > { %p2667_p9 = pnand %p2666_p6, %p2662_p4 }
  0x81   : > { %2670 = shalt.err (!%p2667_p9)
}
  0x82   : > { %s2671_s5 = scalar_lea.vmem %s324_s14, 128  ;;  %s2801_s10 = smov [#allocation3]  }
  0x83   : > { %p2672_p2 = scmp.ne.s32.totalorder %s324_s14, %s2671_s5  ;;  %s2676_s26 = sshll.u32 %s2801_s10, 4  ;;  %s2677_s26 = int_to_ptr.vmem [resolvable:$false] %s2676_s26 }
  0x84   : > { %s2678_s18 = scalar_lea.vmem %s2677_s26, 256  ;;  %p2679_p8 = scmp.lt.s32.totalorder %s324_s14, %s2677_s26 }
  0x85   : > { %p2674_p5 = pnand %p2672_p2, %p3328_p12  ;;  %p2680_p10 = scmp.lt.s32.totalorder %s2678_s18, %s2671_s5 }
  0x87   : > { %p2675_p1 = pneg %p2674_p5  ;;  %p2681_p11 = por %p2680_p10, %p2679_p8 }
  0x89   : > { %p2682_p0 = pnand %p2681_p11, %p2675_p1 }
  0x8b   : > { %2685 = shalt.err (!%p2682_p0)
}
  0x8c   : > { %2447 = dma.hbm_to_vmem [thread:$0]  (!%p2956_p13), %s3022_s28, 128, %s324_s14, %s313_s1  }
  0x8d   : > { %s357_s16 = scalar_lea.hbm %s3282_s2, %s2954_s21  ;;  %s352_s27 = scalar_lea.vmem [#allocation8], %s2951_s20 }
  0x8e   : > { %s359_s24 = sshll.u32 %s352_s27, 4  ;;  %s2686_s19 = scalar_lea.hbm %s357_s16, 128  ;;  %s360_s24 = int_to_ptr.vmem [resolvable:$true] %s359_s24 }
  0x8f   : > { %p2687_p4 = scmp.ne.s32.totalorder %s357_s16, %s2686_s19  ;;  %s2691_s10 = scalar_lea.hbm %s3282_s2, 256 }
  0x90   : > { %p2692_p6 = scmp.lt.s32.totalorder %s357_s16, %s3282_s2  ;;  %p2693_p9 = scmp.lt.s32.totalorder %s2691_s10, %s2686_s19 }
  0x91   : > { %p2689_p7 = pnand %p2687_p4, %p3328_p12 }
  0x92   : > { %p2694_p2 = por %p2693_p9, %p2692_p6 }
  0x93   : > { %p2690_p3 = pneg %p2689_p7 }
  0x95   : > { %p2695_p5 = pnand %p2694_p2, %p2690_p3 }
  0x97   : > { %2698 = shalt.err (!%p2695_p5)
}
  0x98   : > { %s2699_s1 = scalar_lea.vmem %s360_s24, 128  ;;  %s2802_s20 = smov [#allocation8]  }
  0x99   : > { %p2700_p1 = scmp.ne.s32.totalorder %s360_s24, %s2699_s1  ;;  %s2704_s21 = sshll.u32 %s2802_s20, 4  ;;  %s2705_s21 = int_to_ptr.vmem [resolvable:$false] %s2704_s21 }
  0x9a   : > { %s2706_s28 = scalar_lea.vmem %s2705_s21, 256  ;;  %p2707_p11 = scmp.lt.s32.totalorder %s360_s24, %s2705_s21 }
  0x9b   : > { %p2702_p8 = pnand %p2700_p1, %p3328_p12  ;;  %p2708_p0 = scmp.lt.s32.totalorder %s2706_s28, %s2699_s1 }
  0x9d   : > { %p2703_p10 = pneg %p2702_p8  ;;  %p2709_p4 = por %p2708_p0, %p2707_p11 }
  0x9f   : > { %p2710_p7 = pnand %p2709_p4, %p2703_p10 }
  0xa1   : > { %2713 = shalt.err (!%p2710_p7)
}
  0xa2   : > { %2453 = dma.hbm_to_vmem [thread:$0]  (!%p2956_p13), %s357_s16, 128, %s360_s24, %s2970_s3  }
  0xa3   : > { %p3329_p3 = scmp.ne.s32.totalorder %s3309_s13, 0 }
  0xa4   : > { %s3064_s7 = sand.u32 (!%p3329_p3), 1, %s2782_s30   ;;  %p3330_p12 = scmp.ne.s32.totalorder (!%p3329_p3), %s3315_s11, 0 }
  0xa5   : > { %368 = sbr.rel (%p3329_p3) target bundleno = 2413 (0x96d), region = 52  ;;  %s3067_s14 = sshll.u32 (!%p3329_p3), %s3064_s7, 3 }
  0xa6   : > { %s371_s4 = scalar_lea.sflag (!%p3329_p3), [#allocation4], %s3064_s7  ;;  %s374_s23 = scalar_lea.vmem (!%p3329_p3), [#allocation3], %s3067_s14 }
  0xaa   : > { %2757 = dma.done.wait (%p3330_p12), %s371_s4, 128  }
  0xab   : > { %2759 = vsyncadd (%p3330_p12), %s371_s4, 4294967168  ;;  %s379_s3 = sand.u32 1, %s2875_s12   ;;  %s383_s22 = scalar_lea.vmem [#allocation6], %s3067_s14 }
  0xac   : > { %s380_s13 = scalar_lea.sflag [#allocation7], %s379_s3 }
  0xad   : > { %2761 = dma.done.wait (%p3330_p12), %s380_s13, 256  }
  0xae   : > { %2763 = vsyncadd (%p3330_p12), %s380_s13, 4294967040  ;;  %s392_s16 = scalar_lea.vmem [#allocation8], %s3067_s14  ;;  %p3331_p13 = scmp.eq.s32.totalorder %s2875_s12, 0 }
  0xb0   : > { %2765 = dma.done.wait (%p3331_p13), [#allocation10], 5120   ;;  %p3332_p6 = pmov %p3331_p13 }
  0xb2   : > { %2767 = vsyncadd (%p3332_p6), [#allocation10], 4294962176  ;;  %p3333_p9 = pmov %p3332_p6 }
  0xb3   : > { %p3334_p2 = pmov %p3332_p6 }
  0xb4   : > { %2769 = dma.done.wait (%p3333_p9), [#allocation13], 12288  }
  0xb5   : > { %2771 = vsyncadd (%p3334_p2), [#allocation13], 4294955008  ;;  %v2803_v0 = vmov 0.0   ;;  %v467_v1 = vld [vmem:[#allocation9 + $0x68] sm:$0xff]  ;;  %v466_v2 = vld [vmem:[#allocation9 + $0x60] sm:$0xff]  ;;  %vm470_vm0 = vcmask 261120  }
  0xb6   : > { %538 = vmatprep.mubr.f32.mxu0 %v2803_v0  ;;  %609 = vmatprep.mubr.f32.mxu1 %v2803_v0  ;;  %v463_v3 = vld [vmem:[#allocation9 + $0x48] sm:$0xff]  ;;  %v462_v4 = vld [vmem:[#allocation9 + $0x40] sm:$0xff]  ;;  %v3092_v9 = vld [vmem:[%s374_s23] sm:$0xff]  ;;  %vm644_vm1 = vcmask 392192   ;;  %vm822_vm2 = vcmask 523264   ;;  %vm2804_vm3 = vmmov 0  }
  0xb7   : > { %498 = vmatprep.subr.mxu0 %v467_v1  ;;  %v459_v5 = vld [vmem:[#allocation9 + $0x28] sm:$0xff]  ;;  %v458_v6 = vld [vmem:[#allocation9 + $0x20] sm:$0xff]  ;;  %v3106_v39 = vld [vmem:[%s392_s16] sm:$0xff]  ;;  %vm1103_vm4 = vcmask 64512   ;;  %s968_s11 = sld [smem:[#allocation2]]  ;;  %s2140_s27 = sshll.u32 %s2875_s12, 7 }
  0xb8   : > { %499 = vmatpush1.msra.mxu0 %v466_v2  ;;  %v455_v7 = vld [vmem:[#allocation9 + $0x8] sm:$0xff]  ;;  %v454_v8 = vld [vmem:[#allocation9] sm:$0xff]  ;;  %v469_v40 = vld [vmem:[#allocation9 + $0x78] sm:$0xff]  ;;  %s450_s24 = scalar_lea.vmem [#allocation15], %s3067_s14  ;;  %s3243_s10 = scalar_lea.hbm %s3288_s8, %s2140_s27 }
  0xb9   : > { %500 = vmatprep.subr.mxu0 %v463_v3  ;;  %v641_v10 = vld [vmem:[#allocation11 + $0xa8] sm:$0xff]  ;;  %v640_v11 = vld [vmem:[#allocation11 + $0xa0] sm:$0xff]  ;;  %v468_v41 = vld [vmem:[#allocation9 + $0x70] sm:$0xff]  ;;  %569 = vmatprep.subr.mxu1 %v469_v40  ;;  %s1956_s19 = sshll.u32 %s450_s24, 4  ;;  %s1943_s26 = scalar_lea.sflag [#allocation5], %s3064_s7  ;;  %s1957_s19 = int_to_ptr.vmem [resolvable:$true] %s1956_s19 }
  0xba   : > { %501 = vmatpush1.msra.mxu0 %v462_v4  ;;  %v637_v12 = vld [vmem:[#allocation11 + $0x88] sm:$0xff]  ;;  %v636_v13 = vld [vmem:[#allocation11 + $0x80] sm:$0xff]  ;;  %v465_v42 = vld [vmem:[#allocation9 + $0x58] sm:$0xff]  ;;  %570 = vmatpush1.msra.mxu1 %v468_v41  ;;  %s2714_s18 = scalar_lea.vmem %s1957_s19, 128  ;;  %p3335_p1 = scmp.ne.s32.totalorder %s3316_s15, 0 }
  0xbb   : > { %502 = vmatprep.subr.mxu0 %v459_v5  ;;  %v633_v14 = vld [vmem:[#allocation11 + $0x68] sm:$0xff]  ;;  %v632_v15 = vld [vmem:[#allocation11 + $0x60] sm:$0xff]  ;;  %v464_v43 = vld [vmem:[#allocation9 + $0x50] sm:$0xff]  ;;  %571 = vmatprep.subr.mxu1 %v465_v42  ;;  %p2715_p5 = scmp.ne.s32.totalorder %s1957_s19, %s2714_s18  ;;  %s2805_s1 = smov [#allocation15]  }
  0xbc   : > { %503 = vmatpush1.msra.mxu0 %v458_v6  ;;  %v629_v16 = vld [vmem:[#allocation11 + $0x48] sm:$0xff]  ;;  %v628_v17 = vld [vmem:[#allocation11 + $0x40] sm:$0xff]  ;;  %v461_v44 = vld [vmem:[#allocation9 + $0x38] sm:$0xff]  ;;  %572 = vmatpush1.msra.mxu1 %v464_v43  ;;  %s2718_s12 = sshll.u32 %s2805_s1, 4  ;;  %s2719_s12 = int_to_ptr.vmem [resolvable:$false] %s2718_s12 }
  0xbd   : > { %504 = vmatprep.subr.mxu0 %v455_v7  ;;  %v625_v18 = vld [vmem:[#allocation11 + $0x28] sm:$0xff]  ;;  %v624_v19 = vld [vmem:[#allocation11 + $0x20] sm:$0xff]  ;;  %v460_v45 = vld [vmem:[#allocation9 + $0x30] sm:$0xff]  ;;  %573 = vmatprep.subr.mxu1 %v461_v44  ;;  %p2716_p8 = pnand %p2715_p5, %p3335_p1  ;;  %s2720_s20 = scalar_lea.vmem %s2719_s12, 256 }
  0xbe   : > { %505 = vmatpush1.msra.mxu0 %v454_v8  ;;  %v621_v20 = vld [vmem:[#allocation11 + $0x8] sm:$0xff]  ;;  %v620_v21 = vld [vmem:[#allocation11] sm:$0xff]  ;;  %v457_v46 = vld [vmem:[#allocation9 + $0x18] sm:$0xff]  ;;  %574 = vmatpush1.msra.mxu1 %v460_v45  ;;  %p2721_p11 = scmp.lt.s32.totalorder %s1957_s19, %s2719_s12  ;;  %p2722_p0 = scmp.lt.s32.totalorder %s2720_s20, %s2714_s18 }
  0xbf   : > { %2129 = vmatmul.mubr.msk.f32.vlgmr.msra.gmra.mxu0 %vm470_vm0, %v3092_v9  ;;  %668 = vmatprep.subr.mxu0 %v641_v10  ;;  %v3099_v22 = vld [vmem:[%s383_s22] sm:$0xff]  ;;  %v456_v47 = vld [vmem:[#allocation9 + $0x10] sm:$0xff]  ;;  %v643_v48 = vld [vmem:[#allocation11 + $0xb8] sm:$0xff]  ;;  %p2717_p10 = pneg %p2716_p8 }
  0xc0   : > { %669 = vmatpush1.msra.mxu0 %v640_v11  ;;  %712 = vmatprep.mubr.f32.mxu0 %v2803_v0  ;;  %v819_v23 = vld [vmem:[#allocation12 + $0xe8] sm:$0xff]  ;;  %v818_v24 = vld [vmem:[#allocation12 + $0xe0] sm:$0xff]  ;;  %v642_v49 = vld [vmem:[#allocation11 + $0xb0] sm:$0xff]  ;;  %p2723_p4 = por %p2722_p0, %p2721_p11 }
  0xc1   : > { %670 = vmatprep.subr.mxu0 %v637_v12  ;;  %v815_v25 = vld [vmem:[#allocation12 + $0xc8] sm:$0xff]  ;;  %v814_v26 = vld [vmem:[#allocation12 + $0xc0] sm:$0xff]  ;;  %575 = vmatprep.subr.mxu1 %v457_v46  ;;  %v639_v50 = vld [vmem:[#allocation11 + $0x98] sm:$0xff] }
  0xc2   : > { %671 = vmatpush1.msra.mxu0 %v636_v13  ;;  %v811_v27 = vld [vmem:[#allocation12 + $0xa8] sm:$0xff]  ;;  %v810_v28 = vld [vmem:[#allocation12 + $0xa0] sm:$0xff]  ;;  %576 = vmatpush1.msra.mxu1 %v456_v47  ;;  %v638_v51 = vld [vmem:[#allocation11 + $0x90] sm:$0xff]  ;;  %p2724_p7 = pnand %p2723_p4, %p2717_p10 }
  0xc3   : > { %672 = vmatprep.subr.mxu0 %v633_v14  ;;  %v807_v29 = vld [vmem:[#allocation12 + $0x88] sm:$0xff]  ;;  %v806_v30 = vld [vmem:[#allocation12 + $0x80] sm:$0xff]  ;;  %739 = vmatprep.subr.mxu1 %v643_v48  ;;  %v635_v52 = vld [vmem:[#allocation11 + $0x78] sm:$0xff] }
  0xc4   : > { %673 = vmatpush1.msra.mxu0 %v632_v15  ;;  %v803_v31 = vld [vmem:[#allocation12 + $0x68] sm:$0xff]  ;;  %v802_v32 = vld [vmem:[#allocation12 + $0x60] sm:$0xff]  ;;  %2130 = vmatmul.mubr.msk.f32.vlgmr.msra.gmra.mxu1 %vm470_vm0, %v3092_v9  ;;  %v634_v53 = vld [vmem:[#allocation11 + $0x70] sm:$0xff] }
  0xc5   : > { %674 = vmatprep.subr.mxu0 %v629_v16  ;;  %v799_v33 = vld [vmem:[#allocation12 + $0x48] sm:$0xff]  ;;  %v798_v34 = vld [vmem:[#allocation12 + $0x40] sm:$0xff]  ;;  %740 = vmatpush1.msra.mxu1 %v642_v49  ;;  %v631_v54 = vld [vmem:[#allocation11 + $0x58] sm:$0xff] }
  0xc6   : > { %675 = vmatpush1.msra.mxu0 %v628_v17  ;;  %v795_v35 = vld [vmem:[#allocation12 + $0x28] sm:$0xff]  ;;  %v794_v36 = vld [vmem:[#allocation12 + $0x20] sm:$0xff]  ;;  %783 = vmatprep.mubr.f32.mxu1 %v2803_v0  ;;  %v630_v55 = vld [vmem:[#allocation11 + $0x50] sm:$0xff] }
  0xc7   : > { %676 = vmatprep.subr.mxu0 %v625_v18  ;;  %v791_v37 = vld [vmem:[#allocation12 + $0x8] sm:$0xff]  ;;  %v790_v38 = vld [vmem:[#allocation12] sm:$0xff]  ;;  %741 = vmatprep.subr.mxu1 %v639_v50  ;;  %v627_v56 = vld [vmem:[#allocation11 + $0x38] sm:$0xff] }
  0xc8   : > { %677 = vmatpush1.msra.mxu0 %v624_v19  ;;  %742 = vmatpush1.msra.mxu1 %v638_v51  ;;  %v626_v57 = vld [vmem:[#allocation11 + $0x30] sm:$0xff]  ;;  %v623_v58 = vld [vmem:[#allocation11 + $0x18] sm:$0xff]  ;;  %v982_v43 = vld [vmem:[#allocation14 + $0x68] sm:$0xff] }
  0xc9   : > { %678 = vmatprep.subr.mxu0 %v621_v20  ;;  %743 = vmatprep.subr.mxu1 %v635_v52  ;;  %v622_v59 = vld [vmem:[#allocation11 + $0x10] sm:$0xff]  ;;  %v821_v60 = vld [vmem:[#allocation12 + $0xf8] sm:$0xff]  ;;  %v981_v45 = vld [vmem:[#allocation14 + $0x60] sm:$0xff] }
  0xca   : > { %679 = vmatpush1.msra.mxu0 %v620_v21  ;;  %744 = vmatpush1.msra.mxu1 %v634_v53  ;;  %v820_v61 = vld [vmem:[#allocation12 + $0xf0] sm:$0xff]  ;;  %v817_v62 = vld [vmem:[#allocation12 + $0xd8] sm:$0xff]  ;;  %v978_v48 = vld [vmem:[#allocation14 + $0x48] sm:$0xff] }
  0xcb   : > { %2131 = vmatmul.mubr.msk.f32.vlgmr.msra.gmra.mxu0 %vm644_vm1, %v3099_v22  ;;  %842 = vmatprep.subr.mxu0 %v819_v23  ;;  %v816_v63 = vld [vmem:[#allocation12 + $0xd0] sm:$0xff]  ;;  %v813_v1 = vld [vmem:[#allocation12 + $0xb8] sm:$0xff]  ;;  %v977_v49 = vld [vmem:[#allocation14 + $0x40] sm:$0xff] }
  0xcc   : > { %843 = vmatpush1.msra.mxu0 %v818_v24  ;;  %890 = vmatprep.mubr.f32.mxu0 %v2803_v0  ;;  %v812_v2 = vld [vmem:[#allocation12 + $0xb0] sm:$0xff]  ;;  %v809_v3 = vld [vmem:[#allocation12 + $0x98] sm:$0xff]  ;;  %v974_v52 = vld [vmem:[#allocation14 + $0x28] sm:$0xff] }
  0xcd   : > { %844 = vmatprep.subr.mxu0 %v815_v25  ;;  %745 = vmatprep.subr.mxu1 %v631_v54  ;;  %v808_v4 = vld [vmem:[#allocation12 + $0x90] sm:$0xff]  ;;  %v805_v5 = vld [vmem:[#allocation12 + $0x78] sm:$0xff]  ;;  %v973_v53 = vld [vmem:[#allocation14 + $0x20] sm:$0xff] }
  0xce   : > { %845 = vmatpush1.msra.mxu0 %v814_v26  ;;  %746 = vmatpush1.msra.mxu1 %v630_v55  ;;  %v804_v6 = vld [vmem:[#allocation12 + $0x70] sm:$0xff]  ;;  %v801_v7 = vld [vmem:[#allocation12 + $0x58] sm:$0xff]  ;;  %v3130_v26 = vstv %s968_s11 }
  0xcf   : > { %846 = vmatprep.subr.mxu0 %v811_v27  ;;  %747 = vmatprep.subr.mxu1 %v627_v56  ;;  %v800_v8 = vld [vmem:[#allocation12 + $0x50] sm:$0xff]  ;;  %v797_v9 = vld [vmem:[#allocation12 + $0x38] sm:$0xff]  ;;  %v970_v56 = vld [vmem:[#allocation14 + $0x8] sm:$0xff] }
  0xd0   : > { %847 = vmatpush1.msra.mxu0 %v810_v28  ;;  %748 = vmatpush1.msra.mxu1 %v626_v57  ;;  %v796_v10 = vld [vmem:[#allocation12 + $0x30] sm:$0xff]  ;;  %v793_v11 = vld [vmem:[#allocation12 + $0x18] sm:$0xff]  ;;  %v969_v57 = vld [vmem:[#allocation14] sm:$0xff] }
  0xd1   : > { %848 = vmatprep.subr.mxu0 %v807_v29  ;;  %749 = vmatprep.subr.mxu1 %v623_v58  ;;  %v792_v12 = vld [vmem:[#allocation12 + $0x10] sm:$0xff]  ;;  %v980_v46 = vld [vmem:[#allocation14 + $0x58] sm:$0xff] }
  0xd2   : > { %849 = vmatpush1.msra.mxu0 %v806_v30  ;;  %750 = vmatpush1.msra.mxu1 %v622_v59  ;;  %v983_v42 = vld [vmem:[#allocation14 + $0x70] sm:$0xff]  ;;  %v976_v50 = vld [vmem:[#allocation14 + $0x38] sm:$0xff] }
  0xd3   : > { %850 = vmatprep.subr.mxu0 %v803_v31  ;;  %913 = vmatprep.subr.mxu1 %v821_v60  ;;  %v979_v47 = vld [vmem:[#allocation14 + $0x50] sm:$0xff]  ;;  %v972_v54 = vld [vmem:[#allocation14 + $0x18] sm:$0xff]  ;;  %v998_v60 = vld [vmem:[#allocation14 + $0xe8] sm:$0xff] }
  0xd4   : > { %851 = vmatpush1.msra.mxu0 %v802_v32  ;;  %2132 = vmatmul.mubr.msk.f32.vlgmr.msra.gmra.mxu1 %vm644_vm1, %v3099_v22  ;;  %v975_v51 = vld [vmem:[#allocation14 + $0x30] sm:$0xff]  ;;  %v1000_v58 = vld [vmem:[#allocation14 + $0xf8] sm:$0xff] }
  0xd5   : > { %852 = vmatprep.subr.mxu0 %v799_v33  ;;  %914 = vmatpush1.msra.mxu1 %v820_v61  ;;  %v971_v55 = vld [vmem:[#allocation14 + $0x10] sm:$0xff]  ;;  %v997_v61 = vld [vmem:[#allocation14 + $0xe0] sm:$0xff] }
  0xd6   : > { %853 = vmatpush1.msra.mxu0 %v798_v34  ;;  %961 = vmatprep.mubr.f32.mxu1 %v2803_v0  ;;  %v999_v59 = vld [vmem:[#allocation14 + $0xf0] sm:$0xff] }
  0xd7   : > { %854 = vmatprep.subr.mxu0 %v795_v35  ;;  %915 = vmatprep.subr.mxu1 %v817_v62  ;;  %v996_v62 = vld [vmem:[#allocation14 + $0xd8] sm:$0xff] }
  0xd8   : > { %855 = vmatpush1.msra.mxu0 %v794_v36  ;;  %916 = vmatpush1.msra.mxu1 %v816_v63  ;;  %v995_v63 = vld [vmem:[#allocation14 + $0xd0] sm:$0xff] }
  0xd9   : > { %856 = vmatprep.subr.mxu0 %v791_v37  ;;  %917 = vmatprep.subr.mxu1 %v813_v1  ;;  %v994_v1 = vld [vmem:[#allocation14 + $0xc8] sm:$0xff] }
  0xda   : > { %857 = vmatpush1.msra.mxu0 %v790_v38  ;;  %918 = vmatpush1.msra.mxu1 %v812_v2  ;;  %v993_v2 = vld [vmem:[#allocation14 + $0xc0] sm:$0xff] }
  0xdb   : > { %2133 = vmatmul.mubr.msk.f32.vlgmr.msra.gmra.mxu0 %vm822_vm2, %v3106_v39  ;;  %2227 = vmatprep.subr.mxu0 %v2803_v0 }
  0xdc   : > { %2229 = vmatprep.mubr.msk.f32.mxu0 %vm2804_vm3, %v2803_v0  ;;  %919 = vmatprep.subr.mxu1 %v809_v3  ;;  %v992_v3 = vld [vmem:[#allocation14 + $0xb8] sm:$0xff] }
  0xdd   : > { %920 = vmatpush1.msra.mxu1 %v808_v4  ;;  %v991_v4 = vld [vmem:[#allocation14 + $0xb0] sm:$0xff] }
  0xde   : > { %921 = vmatprep.subr.mxu1 %v805_v5  ;;  %v990_v5 = vld [vmem:[#allocation14 + $0xa8] sm:$0xff] }
  0xdf   : > { %922 = vmatpush1.msra.mxu1 %v804_v6  ;;  %v989_v6 = vld [vmem:[#allocation14 + $0xa0] sm:$0xff] }
  0xe0   : > { %923 = vmatprep.subr.mxu1 %v801_v7  ;;  %v988_v7 = vld [vmem:[#allocation14 + $0x98] sm:$0xff] }
  0xe1   : > { %924 = vmatpush1.msra.mxu1 %v800_v8  ;;  %v987_v8 = vld [vmem:[#allocation14 + $0x90] sm:$0xff] }
  0xe2   : > { %925 = vmatprep.subr.mxu1 %v797_v9  ;;  %v986_v9 = vld [vmem:[#allocation14 + $0x88] sm:$0xff] }
  0xe3   : > { %926 = vmatpush1.msra.mxu1 %v796_v10  ;;  %v985_v10 = vld [vmem:[#allocation14 + $0x80] sm:$0xff] }
  0xe4   : > { %927 = vmatprep.subr.mxu1 %v793_v11 }
  0xe5   : > { %928 = vmatpush1.msra.mxu1 %v792_v12 }
  0xe6   : > { %2242 = vmatprep.subr.mxu1 %v2803_v0  ;;  %2134 = vmatmul.mubr.msk.f32.vlgmr.msra.gmra.mxu1 %vm822_vm2, %v3106_v39  ;;  %v984_v39 = vld [vmem:[#allocation14 + $0x78] sm:$0xff] }
  0xe7   : > { %2244 = vmatprep.mubr.msk.f32.mxu1 %vm2804_vm3, %v2803_v0 }
 0x17f   : > { %v540_v13 = vpop.f32.mrf.mxu0 }
 0x180   : > { %v616_v16 = vmul.f32 0.088388346, %v540_v13 }
 0x181   : > { %v542_v14 = vpop.f32.mrf.mxu0 }
 0x182   : > { %v617_v29 = vmul.f32 0.088388346, %v542_v14 }
 0x184   : > { %v611_v13 = vpop.f32.mrf.mxu1 }
 0x186   : > { %v613_v14 = vpop.f32.mrf.mxu1 }
 0x18b   : > { %v714_v15 = vpop.f32.mrf.mxu0 }
 0x18c   : > { %2228 = vmatpush3.xpose.msra.mxu0 %v714_v15 }
 0x18d   : > { %2232 = vmatprep.subr.mxu0 %v2803_v0  ;;  %v716_v17 = vpop.f32.mrf.mxu0 }
 0x18f   : > { %2230 = vmatmul.mubr.f32.vlgmr.msra.gmra.mxu0 %v616_v16 }
 0x190   : > { %2234 = vmatprep.mubr.msk.f32.mxu0 %vm2804_vm3, %v2803_v0 }
 0x194   : > { %v785_v15 = vpop.f32.mrf.mxu1 }
 0x19b   : > { %v892_v18 = vpop.f32.mrf.mxu0 }
 0x19c   : > { %2233 = vmatpush3.msra.mxu0 %v892_v18  ;;  %v787_v18 = vpop.f32.mrf.mxu1 }
 0x19d   : > { %v894_v19 = vpop.f32.mrf.mxu0  ;;  %2237 = vmatprep.subr.mxu0 %v2803_v0 }
 0x19e   : > { %2243 = vmatpush3.msra.mxu1 %v894_v19 }
 0x19f   : > { %2282 = vmatprep.subr.mxu1 %v2803_v0 }
 0x1a6   : > { %v963_v19 = vpop.f32.mrf.mxu1 }
 0x24f   : > { %v1099_v20 = vpop.f32.mrf.mxu0 }
 0x250   : > { %v1104_v21 = vsel %vm1103_vm4, %v1099_v20, -inf  ;;  %vm1114_vm5 = vcmp.gt.f32.partialorder %v1099_v20, %v3130_v26 }
 0x251   : > { %1105 = vmax.xlane.f32.xlu0 %v1104_v21  ;;  %v2231_v22 = vpop.f32.mrf.mxu0 }
 0x2da   : > { %v1106_v23 = vpop.xlane.xlu0 %1105 }
 0x2db   : > { %v1107_v24 = vsub.f32 %v1099_v20, %v1106_v23  ;;  %v965_v20 = vpop.f32.mrf.mxu1 }
 0x2dd   : > { %v1108_v25 = vmul.f32 1.442695, %v1107_v24 }
 0x2df   : > { %2510 = vpow2.f32 %v1108_v25  ;;  %v618_v25 = vmul.f32 0.088388346, %v611_v13  ;;  %v1027_v13 = vld [vmem:[#allocation14 + $0x1d0] sm:$0xff] }
 0x2ec   : > { %v2511_v27 = vpop.eup %2510 }
 0x2ed   : > { %v1115_v28 = vsel %vm1114_vm5, %v2511_v27, 0.0  ;;  %v1110_v44 = vsel %vm1103_vm4, %v2511_v27, 0.0 }
 0x2ee   : > { %2235 = vmatmul.mubr.msk.f32.vlgmr.msra.gmra.mxu0 %vm1103_vm4, %v1115_v28 }
 0x2ef   : > { %2238 = vmatpush3.xpose.msra.mxu0 %v716_v17  ;;  %2239 = vmatprep.mubr.msk.f32.mxu0 %vm2804_vm3, %v2803_v0 }
 0x2f0   : > { %2247 = vmatprep.subr.mxu0 %v2803_v0 }
 0x2f2   : > { %2240 = vmatmul.mubr.f32.vlgmr.msra.gmra.mxu0 %v617_v29 }
 0x2f3   : > { %2279 = vmatprep.mubr.msk.f32.mxu0 %vm2804_vm3, %v2803_v0  ;;  %2248 = vmatpush3.msra.mxu0 %v1000_v58 }
 0x2f4   : > { %2249 = vmatprep.subr.mxu0 %v2803_v0 }
 0x2f5   : > { %2250 = vmatpush3.msra.mxu0 %v999_v59 }
 0x2f6   : > { %2251 = vmatprep.subr.mxu0 %v2803_v0 }
 0x2f7   : > { %2252 = vmatpush3.msra.mxu0 %v998_v60 }
 0x2f8   : > { %2253 = vmatprep.subr.mxu0 %v2803_v0 }
 0x2f9   : > { %2254 = vmatpush3.msra.mxu0 %v997_v61 }
 0x2fa   : > { %2255 = vmatprep.subr.mxu0 %v2803_v0 }
 0x2fb   : > { %2256 = vmatpush3.msra.mxu0 %v996_v62 }
 0x2fc   : > { %2257 = vmatprep.subr.mxu0 %v2803_v0 }
 0x2fd   : > { %2258 = vmatpush3.msra.mxu0 %v995_v63 }
 0x2fe   : > { %2259 = vmatprep.subr.mxu0 %v2803_v0 }
 0x2ff   : > { %2260 = vmatpush3.msra.mxu0 %v994_v1 }
 0x300   : > { %2261 = vmatprep.subr.mxu0 %v2803_v0 }
 0x301   : > { %2262 = vmatpush3.msra.mxu0 %v993_v2 }
 0x302   : > { %2263 = vmatprep.subr.mxu0 %v2803_v0 }
 0x303   : > { %2264 = vmatpush3.msra.mxu0 %v992_v3 }
 0x304   : > { %2265 = vmatprep.subr.mxu0 %v2803_v0 }
 0x305   : > { %2266 = vmatpush3.msra.mxu0 %v991_v4 }
 0x306   : > { %2267 = vmatprep.subr.mxu0 %v2803_v0 }
 0x307   : > { %2268 = vmatpush3.msra.mxu0 %v990_v5 }
 0x308   : > { %2269 = vmatprep.subr.mxu0 %v2803_v0 }
 0x309   : > { %2270 = vmatpush3.msra.mxu0 %v989_v6 }
 0x30a   : > { %2271 = vmatprep.subr.mxu0 %v2803_v0 }
 0x30b   : > { %2272 = vmatpush3.msra.mxu0 %v988_v7 }
 0x30c   : > { %2273 = vmatprep.subr.mxu0 %v2803_v0 }
 0x30d   : > { %2274 = vmatpush3.msra.mxu0 %v987_v8 }
 0x30e   : > { %2275 = vmatprep.subr.mxu0 %v2803_v0 }
 0x30f   : > { %2276 = vmatpush3.msra.mxu0 %v986_v9  ;;  %v1032_v9 = vld [vmem:[#allocation14 + $0x1f8] sm:$0xff] }
 0x310   : > { %2277 = vmatprep.subr.mxu0 %v2803_v0 }
 0x311   : > { %2278 = vmatpush3.msra.mxu0 %v985_v10  ;;  %v1031_v10 = vld [vmem:[#allocation14 + $0x1f0] sm:$0xff] }
 0x312   : > { %2317 = vmatprep.subr.mxu0 %v2803_v0 }
 0x3ae   : > { %v3139_v30 = vpop.f32.mrf.mxu0 }
 0x3b0   : > { %v2236_v31 = vpop.f32.mrf.mxu0 }
 0x3b2   : > { %v1257_v32 = vpop.f32.mrf.mxu0 }
 0x3b3   : > { %v1261_v33 = vsel %vm1103_vm4, %v1257_v32, -inf  ;;  %vm1270_vm6 = vcmp.gt.f32.partialorder %v1257_v32, %v3130_v26 }
 0x3b4   : > { %1262 = vmax.xlane.f32.xlu0 %v1261_v33  ;;  %v2241_v34 = vpop.f32.mrf.mxu0 }
 0x43d   : > { %v1263_v35 = vpop.xlane.xlu0 %1262 }
 0x43e   : > { %v1264_v36 = vsub.f32 %v1257_v32, %v1263_v35 }
 0x440   : > { %v1265_v37 = vmul.f32 1.442695, %v1264_v36 }
 0x442   : > { %2512 = vpow2.f32 %v1265_v37 }
 0x44f   : > { %v2513_v38 = vpop.eup %2512 }
 0x450   : > { %v1271_v40 = vsel %vm1270_vm6, %v2513_v38, 0.0  ;;  %v1267_v41 = vsel %vm1103_vm4, %v2513_v38, 0.0 }
 0x451   : > { %2245 = vmatmul.mubr.msk.f32.vlgmr.msra.gmra.mxu1 %vm1103_vm4, %v1271_v40  ;;  %1268 = vadd.xlane.f32.xlu1 %v1267_v41  ;;  %v619_v41 = vmul.f32 0.088388346, %v613_v14  ;;  %v1026_v14 = vld [vmem:[#allocation14 + $0x1c8] sm:$0xff] }
 0x452   : > { %2283 = vmatpush3.msra.mxu1 %v984_v39  ;;  %2314 = vmatprep.mubr.msk.f32.mxu1 %vm2804_vm3, %v2803_v0 }
 0x453   : > { %2284 = vmatprep.subr.mxu1 %v2803_v0 }
 0x454   : > { %2285 = vmatpush3.msra.mxu1 %v983_v42  ;;  %v1016_v42 = vld [vmem:[#allocation14 + $0x178] sm:$0xff] }
 0x455   : > { %1111 = vadd.xlane.f32.xlu1 %v1110_v44  ;;  %2286 = vmatprep.subr.mxu1 %v2803_v0  ;;  %v1014_v44 = vld [vmem:[#allocation14 + $0x168] sm:$0xff] }
 0x456   : > { %2287 = vmatpush3.msra.mxu1 %v982_v43  ;;  %v1015_v43 = vld [vmem:[#allocation14 + $0x170] sm:$0xff] }
 0x457   : > { %2288 = vmatprep.subr.mxu1 %v2803_v0 }
 0x458   : > { %2289 = vmatpush3.msra.mxu1 %v981_v45  ;;  %v1013_v45 = vld [vmem:[#allocation14 + $0x160] sm:$0xff] }
 0x459   : > { %2290 = vmatprep.subr.mxu1 %v2803_v0 }
 0x45a   : > { %2291 = vmatpush3.msra.mxu1 %v980_v46  ;;  %v1012_v46 = vld [vmem:[#allocation14 + $0x158] sm:$0xff] }
 0x45b   : > { %2292 = vmatprep.subr.mxu1 %v2803_v0 }
 0x45c   : > { %2293 = vmatpush3.msra.mxu1 %v979_v47  ;;  %v1011_v47 = vld [vmem:[#allocation14 + $0x150] sm:$0xff] }
 0x45d   : > { %2294 = vmatprep.subr.mxu1 %v2803_v0 }
 0x45e   : > { %2295 = vmatpush3.msra.mxu1 %v978_v48  ;;  %v1010_v48 = vld [vmem:[#allocation14 + $0x148] sm:$0xff] }
 0x45f   : > { %2296 = vmatprep.subr.mxu1 %v2803_v0 }
 0x460   : > { %2297 = vmatpush3.msra.mxu1 %v977_v49  ;;  %v1009_v49 = vld [vmem:[#allocation14 + $0x140] sm:$0xff] }
 0x461   : > { %2298 = vmatprep.subr.mxu1 %v2803_v0 }
 0x462   : > { %2299 = vmatpush3.msra.mxu1 %v976_v50  ;;  %v1008_v50 = vld [vmem:[#allocation14 + $0x138] sm:$0xff] }
 0x463   : > { %2300 = vmatprep.subr.mxu1 %v2803_v0 }
 0x464   : > { %2301 = vmatpush3.msra.mxu1 %v975_v51  ;;  %v1007_v51 = vld [vmem:[#allocation14 + $0x130] sm:$0xff] }
 0x465   : > { %2302 = vmatprep.subr.mxu1 %v2803_v0 }
 0x466   : > { %2303 = vmatpush3.msra.mxu1 %v974_v52  ;;  %v1006_v52 = vld [vmem:[#allocation14 + $0x128] sm:$0xff] }
 0x467   : > { %2304 = vmatprep.subr.mxu1 %v2803_v0 }
 0x468   : > { %2305 = vmatpush3.msra.mxu1 %v973_v53  ;;  %v1005_v53 = vld [vmem:[#allocation14 + $0x120] sm:$0xff] }
 0x469   : > { %2306 = vmatprep.subr.mxu1 %v2803_v0 }
 0x46a   : > { %2307 = vmatpush3.msra.mxu1 %v972_v54  ;;  %v1004_v54 = vld [vmem:[#allocation14 + $0x118] sm:$0xff] }
 0x46b   : > { %2308 = vmatprep.subr.mxu1 %v2803_v0 }
 0x46c   : > { %2309 = vmatpush3.msra.mxu1 %v971_v55  ;;  %v1003_v55 = vld [vmem:[#allocation14 + $0x110] sm:$0xff] }
 0x46d   : > { %2310 = vmatprep.subr.mxu1 %v2803_v0 }
 0x46e   : > { %2311 = vmatpush3.msra.mxu1 %v970_v56  ;;  %v1002_v56 = vld [vmem:[#allocation14 + $0x108] sm:$0xff] }
 0x46f   : > { %2312 = vmatprep.subr.mxu1 %v2803_v0 }
 0x470   : > { %2313 = vmatpush3.msra.mxu1 %v969_v57  ;;  %v1001_v57 = vld [vmem:[#allocation14 + $0x100] sm:$0xff] }
 0x471   : > { %2322 = vmatprep.subr.mxu1 %v2803_v0 }
 0x4da   : > { %v1269_v11 = vpop.xlane.xlu1 %1268 }
 0x4de   : > { %v1112_v12 = vpop.xlane.xlu1 %1111 }
 0x4df   : > { %2514 = vrcp.f32 %v1112_v12  ;;  %v1029_v12 = vld [vmem:[#allocation14 + $0x1e0] sm:$0xff] }
 0x4e0   : > { %2516 = vrcp.f32 %v1269_v11  ;;  %v1030_v11 = vld [vmem:[#allocation14 + $0x1e8] sm:$0xff] }
 0x4ec   : > { %v2515_v16 = vpop.eup %2514 }
 0x4ed   : > { %v1190_v17 = vmul.f32 %v2515_v16, %v3139_v30  ;;  %v2517_v21 = vpop.eup %2516  ;;  %v1024_v16 = vld [vmem:[#allocation14 + $0x1b8] sm:$0xff] }
 0x4ef   : > { %2315 = vmatmul.mubr.f32.vlgmr.msra.gmra.mxu1 %v1190_v17  ;;  %v1023_v17 = vld [vmem:[#allocation14 + $0x1b0] sm:$0xff] }
 0x4f0   : > { %2323 = vmatpush3.msra.mxu1 %v963_v19  ;;  %2324 = vmatprep.mubr.msk.f32.mxu1 %vm2804_vm3, %v2803_v0  ;;  %v1021_v19 = vld [vmem:[#allocation14 + $0x1a0] sm:$0xff] }
 0x4f1   : > { %2362 = vmatprep.subr.mxu1 %v2803_v0 }
 0x511   : > { %v1341_v22 = vpop.f32.mrf.mxu1 }
 0x512   : > { %v1346_v23 = vmul.f32 %v2517_v21, %v1341_v22  ;;  %v1020_v21 = vld [vmem:[#allocation14 + $0x198] sm:$0xff] }
 0x513   : > { %v2246_v24 = vpop.f32.mrf.mxu1 }
 0x514   : > { %2280 = vmatmul.mubr.f32.vlgmr.msra.gmra.mxu0 %v1346_v23  ;;  %v1019_v24 = vld [vmem:[#allocation14 + $0x190] sm:$0xff] }
 0x515   : > { %2318 = vmatpush3.xpose.msra.mxu0 %v785_v15  ;;  %2319 = vmatprep.mubr.msk.f32.mxu0 %vm2804_vm3, %v2803_v0  ;;  %v1025_v15 = vld [vmem:[#allocation14 + $0x1c0] sm:$0xff] }
 0x516   : > { %2327 = vmatprep.subr.mxu0 %v2803_v0 }
 0x518   : > { %2320 = vmatmul.mubr.f32.vlgmr.msra.gmra.mxu0 %v618_v25  ;;  %v1018_v25 = vld [vmem:[#allocation14 + $0x188] sm:$0xff] }
 0x519   : > { %2359 = vmatprep.mubr.msk.f32.mxu0 %vm2804_vm3, %v2803_v0  ;;  %2328 = vmatpush3.msra.mxu0 %v1016_v42 }
 0x51a   : > { %2329 = vmatprep.subr.mxu0 %v2803_v0 }
 0x51b   : > { %2330 = vmatpush3.msra.mxu0 %v1015_v43 }
 0x51c   : > { %2331 = vmatprep.subr.mxu0 %v2803_v0 }
 0x51d   : > { %2332 = vmatpush3.msra.mxu0 %v1014_v44 }
 0x51e   : > { %2333 = vmatprep.subr.mxu0 %v2803_v0 }
 0x51f   : > { %2334 = vmatpush3.msra.mxu0 %v1013_v45 }
 0x520   : > { %2335 = vmatprep.subr.mxu0 %v2803_v0 }
 0x521   : > { %2336 = vmatpush3.msra.mxu0 %v1012_v46 }
 0x522   : > { %2337 = vmatprep.subr.mxu0 %v2803_v0 }
 0x523   : > { %2338 = vmatpush3.msra.mxu0 %v1011_v47 }
 0x524   : > { %2339 = vmatprep.subr.mxu0 %v2803_v0 }
 0x525   : > { %2340 = vmatpush3.msra.mxu0 %v1010_v48 }
 0x526   : > { %2341 = vmatprep.subr.mxu0 %v2803_v0 }
 0x527   : > { %2342 = vmatpush3.msra.mxu0 %v1009_v49 }
 0x528   : > { %2343 = vmatprep.subr.mxu0 %v2803_v0 }
 0x529   : > { %2344 = vmatpush3.msra.mxu0 %v1008_v50 }
 0x52a   : > { %2345 = vmatprep.subr.mxu0 %v2803_v0 }
 0x52b   : > { %2346 = vmatpush3.msra.mxu0 %v1007_v51 }
 0x52c   : > { %2347 = vmatprep.subr.mxu0 %v2803_v0 }
 0x52d   : > { %2348 = vmatpush3.msra.mxu0 %v1006_v52 }
 0x52e   : > { %2349 = vmatprep.subr.mxu0 %v2803_v0 }
 0x52f   : > { %2350 = vmatpush3.msra.mxu0 %v1005_v53 }
 0x530   : > { %2351 = vmatprep.subr.mxu0 %v2803_v0 }
 0x531   : > { %2352 = vmatpush3.msra.mxu0 %v1004_v54 }
 0x532   : > { %2353 = vmatprep.subr.mxu0 %v2803_v0 }
 0x533   : > { %2354 = vmatpush3.msra.mxu0 %v1003_v55 }
 0x534   : > { %2355 = vmatprep.subr.mxu0 %v2803_v0 }
 0x535   : > { %2356 = vmatpush3.msra.mxu0 %v1002_v56 }
 0x536   : > { %2357 = vmatprep.subr.mxu0 %v2803_v0 }
 0x537   : > { %2358 = vmatpush3.msra.mxu0 %v1001_v57 }
 0x5af   : > { %v1483_v27 = vpop.f32.mrf.mxu1 }
 0x5b1   : > { %v2316_v28 = vpop.f32.mrf.mxu1 }
 0x5d4   : > { %v1413_v29 = vpop.f32.mrf.mxu0 }
 0x5d5   : > { %v3189_v30 = vadd.f32 %v1483_v27, %v1413_v29  ;;  %v1017_v27 = vld [vmem:[#allocation14 + $0x180] sm:$0xff] }
 0x5d6   : > { %v2281_v31 = vpop.f32.mrf.mxu0 }
 0x5d8   : > { %v1553_v32 = vpop.f32.mrf.mxu0 }
 0x5d9   : > { %v1557_v33 = vsel %vm1103_vm4, %v1553_v32, -inf  ;;  %vm1566_vm7 = vcmp.gt.f32.partialorder %v1553_v32, %v3130_v26 }
 0x5da   : > { %1558 = vmax.xlane.f32.xlu0 %v1557_v33  ;;  %v2321_v34 = vpop.f32.mrf.mxu0 }
 0x663   : > { %v1559_v35 = vpop.xlane.xlu0 %1558 }
 0x664   : > { %v1560_v36 = vsub.f32 %v1553_v32, %v1559_v35 }
 0x666   : > { %v1561_v37 = vmul.f32 1.442695, %v1560_v36 }
 0x668   : > { %2518 = vpow2.f32 %v1561_v37 }
 0x675   : > { %v2519_v38 = vpop.eup %2518 }
 0x676   : > { %v1567_v39 = vsel %vm1566_vm7, %v2519_v38, 0.0  ;;  %v1563_v40 = vsel %vm1103_vm4, %v2519_v38, 0.0 }
 0x677   : > { %2325 = vmatmul.mubr.msk.f32.vlgmr.msra.gmra.mxu1 %vm1103_vm4, %v1567_v39  ;;  %1564 = vadd.xlane.f32.xlu0 %v1563_v40 }
 0x678   : > { %2363 = vmatpush3.xpose.msra.mxu1 %v787_v18  ;;  %2364 = vmatprep.mubr.msk.f32.mxu1 %vm2804_vm3, %v2803_v0  ;;  %v1022_v18 = vld [vmem:[#allocation14 + $0x1a8] sm:$0xff] }
 0x679   : > { %2367 = vmatprep.subr.mxu1 %v2803_v0 }
 0x67b   : > { %2365 = vmatmul.mubr.f32.vlgmr.msra.gmra.mxu1 %v619_v41 }
 0x67c   : > { %2368 = vmatpush3.msra.mxu1 %v965_v20  ;;  %2369 = vmatprep.mubr.msk.f32.mxu1 %vm2804_vm3, %v2803_v0 }
 0x67d   : > { %2372 = vmatprep.subr.mxu1 %v2803_v0 }
 0x700   : > { %v1565_v58 = vpop.xlane.xlu0 %1564 }
 0x701   : > { %2520 = vrcp.f32 %v1565_v58 }
 0x70e   : > { %v2521_v59 = vpop.eup %2520 }
 0x737   : > { %v1637_v60 = vpop.f32.mrf.mxu1 }
 0x738   : > { %v1642_v61 = vmul.f32 %v2521_v59, %v1637_v60 }
 0x739   : > { %v2326_v62 = vpop.f32.mrf.mxu1 }
 0x73a   : > { %2360 = vmatmul.mubr.f32.vlgmr.msra.gmra.mxu0 %v1642_v61 }
 0x73b   : > { %v1780_v63 = vpop.f32.mrf.mxu1 }
 0x73c   : > { %v1784_v1 = vsel %vm1103_vm4, %v1780_v63, -inf  ;;  %vm1793_vm8 = vcmp.gt.f32.partialorder %v1780_v63, %v3130_v26  ;;  %v1028_v26 = vld [vmem:[#allocation14 + $0x1d8] sm:$0xff] }
 0x73d   : > { %1785 = vmax.xlane.f32.xlu1 %v1784_v1  ;;  %v2366_v2 = vpop.f32.mrf.mxu1 }
 0x7c6   : > { %v1786_v3 = vpop.xlane.xlu1 %1785 }
 0x7c7   : > { %v1787_v4 = vsub.f32 %v1780_v63, %v1786_v3 }
 0x7c9   : > { %v1788_v5 = vmul.f32 1.442695, %v1787_v4 }
 0x7cb   : > { %2522 = vpow2.f32 %v1788_v5 }
 0x7d8   : > { %v2523_v6 = vpop.eup %2522 }
 0x7d9   : > { %v1794_v7 = vsel %vm1793_vm8, %v2523_v6, 0.0  ;;  %v1790_v8 = vsel %vm1103_vm4, %v2523_v6, 0.0 }
 0x7da   : > { %2370 = vmatmul.mubr.msk.f32.vlgmr.msra.gmra.mxu1 %vm1103_vm4, %v1794_v7  ;;  %1791 = vadd.xlane.f32.xlu1 %v1790_v8 }
 0x7db   : > { %2404 = vmatprep.mubr.msk.f32.mxu1 %vm2804_vm3, %v2803_v0  ;;  %2373 = vmatpush3.msra.mxu1 %v1032_v9 }
 0x7dc   : > { %2374 = vmatprep.subr.mxu1 %v2803_v0 }
 0x7dd   : > { %2375 = vmatpush3.msra.mxu1 %v1031_v10 }
 0x7de   : > { %2376 = vmatprep.subr.mxu1 %v2803_v0 }
 0x7df   : > { %2377 = vmatpush3.msra.mxu1 %v1030_v11 }
 0x7e0   : > { %2378 = vmatprep.subr.mxu1 %v2803_v0 }
 0x7e1   : > { %2379 = vmatpush3.msra.mxu1 %v1029_v12 }
 0x7e2   : > { %2380 = vmatprep.subr.mxu1 %v2803_v0 }
 0x7e3   : > { %2381 = vmatpush3.msra.mxu1 %v1028_v26 }
 0x7e4   : > { %2382 = vmatprep.subr.mxu1 %v2803_v0 }
 0x7e5   : > { %2383 = vmatpush3.msra.mxu1 %v1027_v13 }
 0x7e6   : > { %2384 = vmatprep.subr.mxu1 %v2803_v0 }
 0x7e7   : > { %2385 = vmatpush3.msra.mxu1 %v1026_v14 }
 0x7e8   : > { %2386 = vmatprep.subr.mxu1 %v2803_v0 }
 0x7e9   : > { %2387 = vmatpush3.msra.mxu1 %v1025_v15 }
 0x7ea   : > { %2388 = vmatprep.subr.mxu1 %v2803_v0 }
 0x7eb   : > { %2389 = vmatpush3.msra.mxu1 %v1024_v16 }
 0x7ec   : > { %2390 = vmatprep.subr.mxu1 %v2803_v0 }
 0x7ed   : > { %2391 = vmatpush3.msra.mxu1 %v1023_v17 }
 0x7ee   : > { %2392 = vmatprep.subr.mxu1 %v2803_v0 }
 0x7ef   : > { %2393 = vmatpush3.msra.mxu1 %v1022_v18 }
 0x7f0   : > { %2394 = vmatprep.subr.mxu1 %v2803_v0 }
 0x7f1   : > { %2395 = vmatpush3.msra.mxu1 %v1021_v19 }
 0x7f2   : > { %2396 = vmatprep.subr.mxu1 %v2803_v0 }
 0x7f3   : > { %2397 = vmatpush3.msra.mxu1 %v1020_v21 }
 0x7f4   : > { %2398 = vmatprep.subr.mxu1 %v2803_v0 }
 0x7f5   : > { %2399 = vmatpush3.msra.mxu1 %v1019_v24 }
 0x7f6   : > { %2400 = vmatprep.subr.mxu1 %v2803_v0 }
 0x7f7   : > { %2401 = vmatpush3.msra.mxu1 %v1018_v25 }
 0x7f8   : > { %2402 = vmatprep.subr.mxu1 %v2803_v0 }
 0x7f9   : > { %2403 = vmatpush3.msra.mxu1 %v1017_v27 }
 0x7fa   : > { %v1709_v20 = vpop.f32.mrf.mxu0 }
 0x7fb   : > { %v1713_v22 = vadd.f32 %v1709_v20, %v3189_v30 }
 0x7fc   : > { %v2361_v23 = vpop.f32.mrf.mxu0 }
 0x863   : > { %v1792_v28 = vpop.xlane.xlu1 %1791 }
 0x864   : > { %2524 = vrcp.f32 %v1792_v28 }
 0x871   : > { %v2525_v29 = vpop.eup %2524 }
 0x89a   : > { %v1864_v30 = vpop.f32.mrf.mxu1 }
 0x89b   : > { %v1869_v31 = vmul.f32 %v2525_v29, %v1864_v30 }
 0x89c   : > { %v2371_v32 = vpop.f32.mrf.mxu1 }
 0x89d   : > { %2405 = vmatmul.mubr.f32.vlgmr.msra.gmra.mxu1 %v1869_v31 }
 0x95d   : > { %v1936_v33 = vpop.f32.mrf.mxu1 }
 0x95e   : > { %v1940_v34 = vadd.f32 %v1936_v33, %v1713_v22 }
 0x95f   : > { %v2406_v0 = vpop.f32.mrf.mxu1 }
 0x960   : > { %1941 = vst [vmem:[%s450_s24] sm:$0xff] %v1940_v34 }
 0x961   : > { %2727 = shalt.err (!%p2724_p7)
}
 0x962   : > { %s2728_s21 = scalar_lea.hbm %s3243_s10, 128  ;;  %s2732_s14 = scalar_lea.hbm %s3288_s8, 256 }
 0x963   : > { %p2729_p3 = scmp.ne.s32.totalorder %s3243_s10, %s2728_s21  ;;  %p2733_p6 = scmp.lt.s32.totalorder %s3243_s10, %s3288_s8 }
 0x964   : > { %p2734_p9 = scmp.lt.s32.totalorder %s2732_s14, %s2728_s21 }
 0x965   : > { %p2730_p12 = pnand %p2729_p3, %p3335_p1 }
 0x966   : > { %p2735_p2 = por %p2734_p9, %p2733_p6 }
 0x967   : > { %p2731_p13 = pneg %p2730_p12 }
 0x969   : > { %p2736_p5 = pnand %p2735_p2, %p2731_p13 }
 0x96b   : > { %2739 = shalt.err (!%p2736_p5)
}
 0x96c   : > { %2429 = dma.vmem_to_hbm [thread:$0]  (%p3335_p1), %s1957_s19, 128, %s3243_s10, %s1943_s26  }
 0x96d PF: > { %s3336_s3 = sld [smem:[#allocation21_spill]]  ;;  %s1968_s13 = sand.u32 1, %s2778_s29  }
 0x96e   : > { %p3337_p8 = scmp.ne.s32.totalorder %s3317_s17, 0  ;;  %s1969_s22 = scalar_lea.sflag [#allocation5], %s1968_s13 }
 0x973   : > { %p3338_p10 = scmp.ge.s32.totalorder %s3336_s3, 2 }
 0x975   : > { %p2455_p11 = pnand %p3338_p10, %p3337_p8 }
 0x977   : > { %p2456_p0 = pneg %p2455_p11 }
 0x979   : > { %2773 = dma.done.wait (%p2456_p0), %s1969_s22, 128  }
 0x97a   : > { %2775 = vsyncadd (%p2456_p0), %s1969_s22, 4294967168  ;;  %s3339_s10 = sld [smem:[#allocation22_spill]]  ;;  %s3341_s29 = smov %s2782_s30 }
 0x97b   : > { %s3340_s16 = sld [smem:[#allocation23_spill]]  ;;  %s3342_s30 = smov %s2786_s9 }
 0x980   : > { %p27_p4 = scmp.ge.s32.totalorder %s3339_s10, 4  }
 0x981   : > { %s3343_s9 = smov %s3340_s16 }
 0x982   :  { %29 = sbr.rel (!%p27_p4) target bundleno = 15 (0xf), region = 137 }
 0x987   :  { %1974 = vsyncpa [#allocation4], 1 }
 0x988   :  { %1976 = vsyncpa [#allocation4 + $0x1], 1 }
 0x989   :  { %1977 = vsyncpa [#allocation7], 1 }
 0x98a   :  { %1979 = vsyncpa [#allocation7 + $0x1], 1 }
 0x98b   :  { %1980 = vsyncpa [#allocation10], 1 }
 0x98c   :  { %1981 = vsyncpa [#allocation13], 1 }
 0x98d   :  { %1982 = vsyncpa [#allocation5], 1 }
 0x98e   :  { %1984 = vsyncpa [#allocation5 + $0x1], 1 }

</bundles_post_ra>
